<compile_context>
chip_gen: v5e
topology: v5e:2x2
jax: 0.10.0
libtpu: 0.0.40
codegen_flags: <defaults>
</compile_context>

<pallas_src>
import numpy as np
import jax
import jax.numpy as jnp
from jax.experimental import pallas as pl
from jax.experimental.pallas import tpu as pltpu


# ---------------------------------------------------------------------------
# Static configuration (small, deterministic demo sizes)
# ---------------------------------------------------------------------------
INPUT_SIZE  = 16    # GRU input_size
HIDDEN_SIZE = 32    # GRU hidden_size
BATCH_N     = 2     # N  (rows of hxs)
SEQ_T       = 8     # T  (x has T*N rows in the sequence branch)

LANE = 128          # vreg lane width; each gate is padded to a full lane block


# ---------------------------------------------------------------------------
# Pallas kernel: fused masked GRU recurrence over T timesteps
# ---------------------------------------------------------------------------
def _gru_kernel(x_ref, h0_ref, m_ref, wih_ref, whh_ref, bih_ref, bhn_ref,
                out_ref, hn_ref):
    # Shapes (HP = padded per-gate width, multiple of 128; cols >= H are zero):
    #   x_ref  : (T*N, I)    flattened inputs for all timesteps
    #   h0_ref : (N, HP)     initial hidden state (padded cols are zero)
    #   m_ref  : (T, N, HP)  binary masks pre-broadcast over the hidden dim
    #   wih_ref: (I, 3*HP)   input->gates weight, gate-padded (r | z | n)
    #   whh_ref: (HP, 3*HP)  hidden->gates weight, gate-padded
    #   bih_ref: (1, 3*HP)   b_ih with b_hh folded into the r/z slices
    #   bhn_ref: (1, HP)     b_hh n-gate slice only
    #   out_ref: (T, N, HP)  per-step hidden outputs
    #   hn_ref : (N, HP)     final hidden state
    N, HP = h0_ref.shape
    T = out_ref.shape[0]

    # Loop-invariant loads hoisted out of the recurrence (loaded once).
    whh = whh_ref[...]
    bhn = bhn_ref[...]
    m_all = m_ref[...]

    # One fused input projection for every timestep (no recurrence on the
    # input path): a single (T*N, I) x (I, 3*HP) MXU matmul.  r/z b_hh is
    # already folded into bih, so the serial loop never adds a full-gates bias.
    gi_all = jnp.dot(x_ref[...], wih_ref[...],
                     preferred_element_type=jnp.float32) + bih_ref[...]

    h = h0_ref[...]
    # T is small & static -> full unroll.
    # TODO(synk): for large T switch to lax.fori_loop(..., unroll=True) over
    #   chunks (and a T-chunked "arbitrary" grid axis) to bound vreg live
    #   ranges and v7x VMEM residency.
    for t in range(T):
        h = h * m_all[t]                      # mask == 0 resets the hidden state
        gi = gi_all[t * N:(t + 1) * N, :]     # (N, 3*HP) static slice
        gh = jnp.dot(h, whh, preferred_element_type=jnp.float32)
        # Fused r/z sigmoid: one EUP push; gate slices land on 128-lane
        # boundaries (0 / HP / 2*HP) so they are free.
        rz = jax.nn.sigmoid(gi[:, :2 * HP] + gh[:, :2 * HP])
        r = rz[:, :HP]
        z = rz[:, HP:]
        n = jnp.tanh(gi[:, 2 * HP:] + r * (gh[:, 2 * HP:] + bhn))
        h = (1.0 - z) * n + z * h
        out_ref[t] = h                        # lane-dense (N, HP) tile store
    hn_ref[...] = h


# ---------------------------------------------------------------------------
# Wrapper (handles both torch branches: T == 1 and T > 1)
# ---------------------------------------------------------------------------
def _pad_gate_cols(w, H, HP):
    """(rows, 3H) -> (rows, 3*HP): gate g placed at columns [g*HP, g*HP+H)."""
    rows = w.shape[0]
    out = jnp.zeros((rows, 3 * HP), jnp.float32)
    for g in range(3):
        out = out.at[:, g * HP:g * HP + H].set(w[:, g * H:(g + 1) * H])
    return out


def gru_forward(x, hxs, masks, w_ih, w_hh, b_ih, b_hh):
    """x: (T*N, I), hxs: (N, H), masks: (T*N,) -> (out (T*N, H), h_n (N, H))."""
    x = x.astype(jnp.float32)
    hxs = hxs.astype(jnp.float32)
    N, H = hxs.shape
    TN, I = x.shape
    assert TN % N == 0
    T = TN // N
    HP = ((H + LANE - 1) // LANE) * LANE      # gate width padded to lane width

    # Gate-padded, transposed parameters (PyTorch layout is (3H, I)/(3H, H)).
    wih_p = _pad_gate_cols(jnp.asarray(w_ih, jnp.float32).T, H, HP)      # (I, 3HP)
    whh_p = jnp.zeros((HP, 3 * HP), jnp.float32).at[:H].set(
        _pad_gate_cols(jnp.asarray(w_hh, jnp.float32).T, H, HP))         # (HP, 3HP)

    b_ih = jnp.asarray(b_ih, jnp.float32)
    b_hh = jnp.asarray(b_hh, jnp.float32)
    # Fold b_hh's r/z slices into b_ih (sigmoid(gi+gh) is unchanged); keep the
    # n-gate b_hn separate: torch GRUCell n = tanh(W_in x + b_in + r*(W_hn h + b_hn)).
    b_rz = b_ih[:2 * H] + b_hh[:2 * H]
    b_folded = jnp.concatenate([b_rz, b_ih[2 * H:]]).reshape(1, 3 * H)
    bih_p = _pad_gate_cols(b_folded, H, HP)                              # (1, 3HP)
    bhn_p = jnp.zeros((1, HP), jnp.float32).at[0, :H].set(b_hh[2 * H:])  # (1, HP)

    h0_p = jnp.zeros((N, HP), jnp.float32).at[:, :H].set(hxs)            # (N, HP)
    # Pre-broadcast masks over the hidden dim (tiny) so the per-step multiply
    # needs no in-loop broadcast_in_dim / tiny masked loads.
    m3 = jnp.broadcast_to(masks.reshape(T, N, 1).astype(jnp.float32), (T, N, HP))

    out3, hn = pl.pallas_call(
        _gru_kernel,
        out_shape=(jax.ShapeDtypeStruct((T, N, HP), jnp.float32),
                   jax.ShapeDtypeStruct((N, HP), jnp.float32)),
        grid=(1,),  # collapsed grid: one step, everything resident in VMEM
        in_specs=[
            pl.BlockSpec((TN, I), lambda i: (0, 0)),
            pl.BlockSpec((N, HP), lambda i: (0, 0)),
            pl.BlockSpec((T, N, HP), lambda i: (0, 0, 0)),
            pl.BlockSpec((I, 3 * HP), lambda i: (0, 0)),
            pl.BlockSpec((HP, 3 * HP), lambda i: (0, 0)),
            pl.BlockSpec((1, 3 * HP), lambda i: (0, 0)),
            pl.BlockSpec((1, HP), lambda i: (0, 0)),
        ],
        out_specs=(pl.BlockSpec((T, N, HP), lambda i: (0, 0, 0)),
                   pl.BlockSpec((N, HP), lambda i: (0, 0))),
        compiler_params=pltpu.CompilerParams(
            dimension_semantics=("arbitrary",)),
    )(x, h0_p, m3, wih_p, whh_p, bih_p, bhn_p)

    # Cheap wrapper-side un-padding back to the torch shapes.
    return out3[:, :, :H].reshape(TN, H), hn[:, :H]


# ---------------------------------------------------------------------------
# Pure-JAX reference of the intended torch semantics
# ---------------------------------------------------------------------------
def reference_forward(x, hxs, masks, w_ih, w_hh, b_ih, b_hh):
    N, H = hxs.shape
    T = x.shape[0] // N
    x3 = x.reshape(T, N, -1)
    m3 = masks.reshape(T, N, 1)
    h = hxs
    outs = []
    for t in range(T):
        h = h * m3[t]
        gi = x3[t] @ w_ih.T + b_ih
        gh = h @ w_hh.T + b_hh
        r = jax.nn.sigmoid(gi[:, :H] + gh[:, :H])
        z = jax.nn.sigmoid(gi[:, H:2 * H] + gh[:, H:2 * H])
        n = jnp.tanh(gi[:, 2 * H:] + r * gh[:, 2 * H:])
        h = (1.0 - z) * n + z * h
        outs.append(h)
    return jnp.concatenate(outs, axis=0), h


def _orthogonal(key, rows, cols):
    """Deterministic orthogonal init (matches orthogonal_init(gain=1.0) in spirit)."""
    a = jax.random.normal(key, (max(rows, cols), min(rows, cols)), jnp.float32)
    q, _ = jnp.linalg.qr(a)
    return q[:rows, :cols] if rows >= cols else q[:cols, :rows].T


# ---------------------------------------------------------------------------
if __name__ == "__main__":
    key = jax.random.PRNGKey(0)
    k_x, k_x1, k_h, k_wih, k_whh, k_bih, k_bhh = jax.random.split(key, 7)

    I, H, N, T = INPUT_SIZE, HIDDEN_SIZE, BATCH_N, SEQ_T

    # GRU parameters (PyTorch layout: weight_ih_l0 (3H, I), weight_hh_l0 (3H, H))
    w_ih = _orthogonal(k_wih, 3 * H, I)
    w_hh = _orthogonal(k_whh, 3 * H, H)
    b_ih = 0.1 * jax.random.normal(k_bih, (3 * H,), jnp.float32)
    b_hh = 0.1 * jax.random.normal(k_bhh, (3 * H,), jnp.float32)

    # ---- sequence branch: x is (T*N, I), masks (T*N,) with episode resets ----
    x = jax.random.normal(k_x, (T * N, I), jnp.float32)
    hxs = jax.random.normal(k_h, (N, H), jnp.float32)
    masks = jnp.ones((T, N), jnp.float32)
    masks = masks.at[0, :].set(0.0).at[3, 0].set(0.0).at[5, 1].set(0.0)
    masks = masks.reshape(T * N)

    out, h_n = gru_forward(x, hxs, masks, w_ih, w_hh, b_ih, b_hh)
    out = jax.block_until_ready(out)
    h_n = jax.block_until_ready(h_n)

    ref_out, ref_hn = reference_forward(x, hxs, masks, w_ih, w_hh, b_ih, b_hh)
    assert out.shape == (T * N, H) and h_n.shape == (N, H)
    np.testing.assert_allclose(np.asarray(out), np.asarray(ref_out),
                               rtol=2e-5, atol=2e-5)
    np.testing.assert_allclose(np.asarray(h_n), np.asarray(ref_hn),
                               rtol=2e-5, atol=2e-5)

    # ---- single-step branch: x.size(0) == hxs.size(0) (T == 1) ----
    x1 = jax.random.normal(k_x1, (N, I), jnp.float32)
    m1 = jnp.array([1.0, 0.0], jnp.float32)
    out1, h1 = gru_forward(x1, hxs, m1, w_ih, w_hh, b_ih, b_hh)
    out1 = jax.block_until_ready(out1)
    ref1, refh1 = reference_forward(x1, hxs, m1, w_ih, w_hh, b_ih, b_hh)
    np.testing.assert_allclose(np.asarray(out1), np.asarray(ref1),
                               rtol=2e-5, atol=2e-5)
    np.testing.assert_allclose(np.asarray(h1), np.asarray(refh1),
                               rtol=2e-5, atol=2e-5)

    print("KERNEL_OK")
</pallas_src>

<mosaic_0001>
module attributes {stable_mosaic.version = 11 : i64} {
  func.func @_gru_kernel(%arg0: i32, %arg1: memref<16x16xf32, #tpu.memory_space<vmem>>, %arg2: memref<2x128xf32, #tpu.memory_space<vmem>>, %arg3: memref<8x2x128xf32, #tpu.memory_space<vmem>>, %arg4: memref<16x384xf32, #tpu.memory_space<vmem>>, %arg5: memref<128x384xf32, #tpu.memory_space<vmem>>, %arg6: memref<1x384xf32, #tpu.memory_space<vmem>>, %arg7: memref<1x128xf32, #tpu.memory_space<vmem>>, %arg8: memref<8x2x128xf32, #tpu.memory_space<vmem>>, %arg9: memref<2x128xf32, #tpu.memory_space<vmem>>) attributes {dimension_semantics = [#tpu.dimension_semantics<arbitrary>], iteration_bounds = array<i64: 1>, scalar_prefetch = 0 : i64, scratch_operands = 0 : i64, tpu.core_type = #tpu.core_type<tc>, window_params = [{pipeline_mode = #tpu.pipeline_mode<synchronous>, transform_indices = @transform_0, window_bounds = array<i64: 16, 16>}, {pipeline_mode = #tpu.pipeline_mode<synchronous>, transform_indices = @transform_1, window_bounds = array<i64: 2, 128>}, {pipeline_mode = #tpu.pipeline_mode<synchronous>, transform_indices = @transform_2, window_bounds = array<i64: 8, 2, 128>}, {pipeline_mode = #tpu.pipeline_mode<synchronous>, transform_indices = @transform_3, window_bounds = array<i64: 16, 384>}, {pipeline_mode = #tpu.pipeline_mode<synchronous>, transform_indices = @transform_4, window_bounds = array<i64: 128, 384>}, {pipeline_mode = #tpu.pipeline_mode<synchronous>, transform_indices = @transform_5, window_bounds = array<i64: 1, 384>}, {pipeline_mode = #tpu.pipeline_mode<synchronous>, transform_indices = @transform_6, window_bounds = array<i64: 1, 128>}, {pipeline_mode = #tpu.pipeline_mode<synchronous>, transform_indices = @transform_7, window_bounds = array<i64: 8, 2, 128>}, {pipeline_mode = #tpu.pipeline_mode<synchronous>, transform_indices = @transform_8, window_bounds = array<i64: 2, 128>}]} {
    %c0 = arith.constant 0 : index
    %c0_0 = arith.constant 0 : index
    %0 = vector.load %arg5[%c0, %c0_0] : memref<128x384xf32, #tpu.memory_space<vmem>>, vector<128x384xf32>
    %c0_1 = arith.constant 0 : index
    %c0_2 = arith.constant 0 : index
    %1 = vector.load %arg7[%c0_1, %c0_2] : memref<1x128xf32, #tpu.memory_space<vmem>>, vector<1x128xf32>
    %c0_3 = arith.constant 0 : index
    %c0_4 = arith.constant 0 : index
    %c0_5 = arith.constant 0 : index
    %2 = vector.load %arg3[%c0_3, %c0_4, %c0_5] : memref<8x2x128xf32, #tpu.memory_space<vmem>>, vector<8x2x128xf32>
    %c0_6 = arith.constant 0 : index
    %c0_7 = arith.constant 0 : index
    %3 = vector.load %arg1[%c0_6, %c0_7] : memref<16x16xf32, #tpu.memory_space<vmem>>, vector<16x16xf32>
    %c0_8 = arith.constant 0 : index
    %c0_9 = arith.constant 0 : index
    %4 = vector.load %arg4[%c0_8, %c0_9] : memref<16x384xf32, #tpu.memory_space<vmem>>, vector<16x384xf32>
    %cst = arith.constant dense<0.000000e+00> : vector<16x384xf32>
    %5 = tpu.matmul %3, %4, %cst {dimension_numbers = #tpu.dot_dimension_numbers<[1], [0], [0], [1], [0, 0, 1, 1], [], []>} : vector<16x16xf32>, vector<16x384xf32>, vector<16x384xf32> -> vector<16x384xf32>
    %c0_10 = arith.constant 0 : index
    %c0_11 = arith.constant 0 : index
    %6 = vector.load %arg6[%c0_10, %c0_11] : memref<1x384xf32, #tpu.memory_space<vmem>>, vector<1x384xf32>
    %7 = vector.broadcast %6 : vector<1x384xf32> to vector<16x384xf32>
    %8 = arith.addf %5, %7 : vector<16x384xf32>
    %c0_12 = arith.constant 0 : index
    %c0_13 = arith.constant 0 : index
    %9 = vector.load %arg2[%c0_12, %c0_13] : memref<2x128xf32, #tpu.memory_space<vmem>>, vector<2x128xf32>
    %10 = vector.extract_strided_slice %2 {offsets = [0, 0, 0], sizes = [1, 2, 128], strides = [1, 1, 1]} : vector<8x2x128xf32> to vector<1x2x128xf32>
    %11 = vector.shape_cast %10 : vector<1x2x128xf32> to vector<2x128xf32>
    %12 = arith.mulf %9, %11 : vector<2x128xf32>
    %13 = vector.extract_strided_slice %8 {offsets = [0, 0], sizes = [2, 384], strides = [1, 1]} : vector<16x384xf32> to vector<2x384xf32>
    %cst_14 = arith.constant dense<0.000000e+00> : vector<2x384xf32>
    %14 = tpu.matmul %12, %0, %cst_14 {dimension_numbers = #tpu.dot_dimension_numbers<[1], [0], [0], [1], [0, 0, 1, 1], [], []>} : vector<2x128xf32>, vector<128x384xf32>, vector<2x384xf32> -> vector<2x384xf32>
    %15 = vector.extract_strided_slice %13 {offsets = [0, 0], sizes = [2, 256], strides = [1, 1]} : vector<2x384xf32> to vector<2x256xf32>
    %16 = vector.extract_strided_slice %14 {offsets = [0, 0], sizes = [2, 256], strides = [1, 1]} : vector<2x384xf32> to vector<2x256xf32>
    %17 = arith.addf %15, %16 : vector<2x256xf32>
    %18 = arith.negf %17 : vector<2x256xf32>
    %19 = math.exp %18 : vector<2x256xf32>
    %cst_15 = arith.constant 1.000000e+00 : f32
    %20 = vector.broadcast %cst_15 : f32 to vector<2x256xf32>
    %21 = arith.addf %20, %19 : vector<2x256xf32>
    %22 = arith.divf %20, %21 : vector<2x256xf32>
    %23 = vector.extract_strided_slice %22 {offsets = [0, 0], sizes = [2, 128], strides = [1, 1]} : vector<2x256xf32> to vector<2x128xf32>
    %24 = vector.extract_strided_slice %22 {offsets = [0, 128], sizes = [2, 128], strides = [1, 1]} : vector<2x256xf32> to vector<2x128xf32>
    %25 = vector.extract_strided_slice %13 {offsets = [0, 256], sizes = [2, 128], strides = [1, 1]} : vector<2x384xf32> to vector<2x128xf32>
    %26 = vector.extract_strided_slice %14 {offsets = [0, 256], sizes = [2, 128], strides = [1, 1]} : vector<2x384xf32> to vector<2x128xf32>
    %27 = vector.broadcast %1 : vector<1x128xf32> to vector<2x128xf32>
    %28 = arith.addf %26, %27 : vector<2x128xf32>
    %29 = arith.mulf %23, %28 : vector<2x128xf32>
    %30 = arith.addf %25, %29 : vector<2x128xf32>
    %31 = math.tanh %30 : vector<2x128xf32>
    %cst_16 = arith.constant 1.000000e+00 : f32
    %32 = vector.broadcast %cst_16 : f32 to vector<2x128xf32>
    %33 = arith.subf %32, %24 : vector<2x128xf32>
    %34 = arith.mulf %33, %31 : vector<2x128xf32>
    %35 = arith.mulf %24, %12 : vector<2x128xf32>
    %36 = arith.addf %34, %35 : vector<2x128xf32>
    %c0_17 = arith.constant 0 : index
    %c0_18 = arith.constant 0 : index
    %c0_19 = arith.constant 0 : index
    %37 = vector.load %arg8[%c0_17, %c0_18, %c0_19] : memref<8x2x128xf32, #tpu.memory_space<vmem>>, vector<1x2x128xf32>
    %38 = vector.shape_cast %37 : vector<1x2x128xf32> to vector<2x128xf32>
    %39 = vector.shape_cast %36 : vector<2x128xf32> to vector<1x2x128xf32>
    tpu.vector_store %arg8[%c0_17, %c0_18, %c0_19], %39 {strides = array<i32>} : memref<8x2x128xf32, #tpu.memory_space<vmem>>, vector<1x2x128xf32>,
    %40 = vector.extract_strided_slice %2 {offsets = [1, 0, 0], sizes = [1, 2, 128], strides = [1, 1, 1]} : vector<8x2x128xf32> to vector<1x2x128xf32>
    %41 = vector.shape_cast %40 : vector<1x2x128xf32> to vector<2x128xf32>
    %42 = arith.mulf %36, %41 : vector<2x128xf32>
    %43 = vector.extract_strided_slice %8 {offsets = [2, 0], sizes = [2, 384], strides = [1, 1]} : vector<16x384xf32> to vector<2x384xf32>
    %cst_20 = arith.constant dense<0.000000e+00> : vector<2x384xf32>
    %44 = tpu.matmul %42, %0, %cst_20 {dimension_numbers = #tpu.dot_dimension_numbers<[1], [0], [0], [1], [0, 0, 1, 1], [], []>} : vector<2x128xf32>, vector<128x384xf32>, vector<2x384xf32> -> vector<2x384xf32>
    %45 = vector.extract_strided_slice %43 {offsets = [0, 0], sizes = [2, 256], strides = [1, 1]} : vector<2x384xf32> to vector<2x256xf32>
    %46 = vector.extract_strided_slice %44 {offsets = [0, 0], sizes = [2, 256], strides = [1, 1]} : vector<2x384xf32> to vector<2x256xf32>
    %47 = arith.addf %45, %46 : vector<2x256xf32>
    %48 = arith.negf %47 : vector<2x256xf32>
    %49 = math.exp %48 : vector<2x256xf32>
    %cst_21 = arith.constant 1.000000e+00 : f32
    %50 = vector.broadcast %cst_21 : f32 to vector<2x256xf32>
    %51 = arith.addf %50, %49 : vector<2x256xf32>
    %52 = arith.divf %50, %51 : vector<2x256xf32>
    %53 = vector.extract_strided_slice %52 {offsets = [0, 0], sizes = [2, 128], strides = [1, 1]} : vector<2x256xf32> to vector<2x128xf32>
    %54 = vector.extract_strided_slice %52 {offsets = [0, 128], sizes = [2, 128], strides = [1, 1]} : vector<2x256xf32> to vector<2x128xf32>
    %55 = vector.extract_strided_slice %43 {offsets = [0, 256], sizes = [2, 128], strides = [1, 1]} : vector<2x384xf32> to vector<2x128xf32>
    %56 = vector.extract_strided_slice %44 {offsets = [0, 256], sizes = [2, 128], strides = [1, 1]} : vector<2x384xf32> to vector<2x128xf32>
    %57 = vector.broadcast %1 : vector<1x128xf32> to vector<2x128xf32>
    %58 = arith.addf %56, %57 : vector<2x128xf32>
    %59 = arith.mulf %53, %58 : vector<2x128xf32>
    %60 = arith.addf %55, %59 : vector<2x128xf32>
    %61 = math.tanh %60 : vector<2x128xf32>
    %cst_22 = arith.constant 1.000000e+00 : f32
    %62 = vector.broadcast %cst_22 : f32 to vector<2x128xf32>
    %63 = arith.subf %62, %54 : vector<2x128xf32>
    %64 = arith.mulf %63, %61 : vector<2x128xf32>
    %65 = arith.mulf %54, %42 : vector<2x128xf32>
    %66 = arith.addf %64, %65 : vector<2x128xf32>
    %c1 = arith.constant 1 : index
    %c0_23 = arith.constant 0 : index
    %c0_24 = arith.constant 0 : index
    %67 = vector.load %arg8[%c1, %c0_23, %c0_24] : memref<8x2x128xf32, #tpu.memory_space<vmem>>, vector<1x2x128xf32>
    %68 = vector.shape_cast %67 : vector<1x2x128xf32> to vector<2x128xf32>
    %69 = vector.shape_cast %66 : vector<2x128xf32> to vector<1x2x128xf32>
    tpu.vector_store %arg8[%c1, %c0_23, %c0_24], %69 {strides = array<i32>} : memref<8x2x128xf32, #tpu.memory_space<vmem>>, vector<1x2x128xf32>,
    %70 = vector.extract_strided_slice %2 {offsets = [2, 0, 0], sizes = [1, 2, 128], strides = [1, 1, 1]} : vector<8x2x128xf32> to vector<1x2x128xf32>
    %71 = vector.shape_cast %70 : vector<1x2x128xf32> to vector<2x128xf32>
    %72 = arith.mulf %66, %71 : vector<2x128xf32>
    %73 = vector.extract_strided_slice %8 {offsets = [4, 0], sizes = [2, 384], strides = [1, 1]} : vector<16x384xf32> to vector<2x384xf32>
    %cst_25 = arith.constant dense<0.000000e+00> : vector<2x384xf32>
    %74 = tpu.matmul %72, %0, %cst_25 {dimension_numbers = #tpu.dot_dimension_numbers<[1], [0], [0], [1], [0, 0, 1, 1], [], []>} : vector<2x128xf32>, vector<128x384xf32>, vector<2x384xf32> -> vector<2x384xf32>
    %75 = vector.extract_strided_slice %73 {offsets = [0, 0], sizes = [2, 256], strides = [1, 1]} : vector<2x384xf32> to vector<2x256xf32>
    %76 = vector.extract_strided_slice %74 {offsets = [0, 0], sizes = [2, 256], strides = [1, 1]} : vector<2x384xf32> to vector<2x256xf32>
    %77 = arith.addf %75, %76 : vector<2x256xf32>
    %78 = arith.negf %77 : vector<2x256xf32>
    %79 = math.exp %78 : vector<2x256xf32>
    %cst_26 = arith.constant 1.000000e+00 : f32
    %80 = vector.broadcast %cst_26 : f32 to vector<2x256xf32>
    %81 = arith.addf %80, %79 : vector<2x256xf32>
    %82 = arith.divf %80, %81 : vector<2x256xf32>
    %83 = vector.extract_strided_slice %82 {offsets = [0, 0], sizes = [2, 128], strides = [1, 1]} : vector<2x256xf32> to vector<2x128xf32>
    %84 = vector.extract_strided_slice %82 {offsets = [0, 128], sizes = [2, 128], strides = [1, 1]} : vector<2x256xf32> to vector<2x128xf32>
    %85 = vector.extract_strided_slice %73 {offsets = [0, 256], sizes = [2, 128], strides = [1, 1]} : vector<2x384xf32> to vector<2x128xf32>
    %86 = vector.extract_strided_slice %74 {offsets = [0, 256], sizes = [2, 128], strides = [1, 1]} : vector<2x384xf32> to vector<2x128xf32>
    %87 = vector.broadcast %1 : vector<1x128xf32> to vector<2x128xf32>
    %88 = arith.addf %86, %87 : vector<2x128xf32>
    %89 = arith.mulf %83, %88 : vector<2x128xf32>
    %90 = arith.addf %85, %89 : vector<2x128xf32>
    %91 = math.tanh %90 : vector<2x128xf32>
    %cst_27 = arith.constant 1.000000e+00 : f32
    %92 = vector.broadcast %cst_27 : f32 to vector<2x128xf32>
    %93 = arith.subf %92, %84 : vector<2x128xf32>
    %94 = arith.mulf %93, %91 : vector<2x128xf32>
    %95 = arith.mulf %84, %72 : vector<2x128xf32>
    %96 = arith.addf %94, %95 : vector<2x128xf32>
    %c2 = arith.constant 2 : index
    %c0_28 = arith.constant 0 : index
    %c0_29 = arith.constant 0 : index
    %97 = vector.load %arg8[%c2, %c0_28, %c0_29] : memref<8x2x128xf32, #tpu.memory_space<vmem>>, vector<1x2x128xf32>
    %98 = vector.shape_cast %97 : vector<1x2x128xf32> to vector<2x128xf32>
    %99 = vector.shape_cast %96 : vector<2x128xf32> to vector<1x2x128xf32>
    tpu.vector_store %arg8[%c2, %c0_28, %c0_29], %99 {strides = array<i32>} : memref<8x2x128xf32, #tpu.memory_space<vmem>>, vector<1x2x128xf32>,
    %100 = vector.extract_strided_slice %2 {offsets = [3, 0, 0], sizes = [1, 2, 128], strides = [1, 1, 1]} : vector<8x2x128xf32> to vector<1x2x128xf32>
    %101 = vector.shape_cast %100 : vector<1x2x128xf32> to vector<2x128xf32>
    %102 = arith.mulf %96, %101 : vector<2x128xf32>
    %103 = vector.extract_strided_slice %8 {offsets = [6, 0], sizes = [2, 384], strides = [1, 1]} : vector<16x384xf32> to vector<2x384xf32>
    %cst_30 = arith.constant dense<0.000000e+00> : vector<2x384xf32>
    %104 = tpu.matmul %102, %0, %cst_30 {dimension_numbers = #tpu.dot_dimension_numbers<[1], [0], [0], [1], [0, 0, 1, 1], [], []>} : vector<2x128xf32>, vector<128x384xf32>, vector<2x384xf32> -> vector<2x384xf32>
    %105 = vector.extract_strided_slice %103 {offsets = [0, 0], sizes = [2, 256], strides = [1, 1]} : vector<2x384xf32> to vector<2x256xf32>
    %106 = vector.extract_strided_slice %104 {offsets = [0, 0], sizes = [2, 256], strides = [1, 1]} : vector<2x384xf32> to vector<2x256xf32>
    %107 = arith.addf %105, %106 : vector<2x256xf32>
    %108 = arith.negf %107 : vector<2x256xf32>
    %109 = math.exp %108 : vector<2x256xf32>
    %cst_31 = arith.constant 1.000000e+00 : f32
    %110 = vector.broadcast %cst_31 : f32 to vector<2x256xf32>
    %111 = arith.addf %110, %109 : vector<2x256xf32>
    %112 = arith.divf %110, %111 : vector<2x256xf32>
    %113 = vector.extract_strided_slice %112 {offsets = [0, 0], sizes = [2, 128], strides = [1, 1]} : vector<2x256xf32> to vector<2x128xf32>
    %114 = vector.extract_strided_slice %112 {offsets = [0, 128], sizes = [2, 128], strides = [1, 1]} : vector<2x256xf32> to vector<2x128xf32>
    %115 = vector.extract_strided_slice %103 {offsets = [0, 256], sizes = [2, 128], strides = [1, 1]} : vector<2x384xf32> to vector<2x128xf32>
    %116 = vector.extract_strided_slice %104 {offsets = [0, 256], sizes = [2, 128], strides = [1, 1]} : vector<2x384xf32> to vector<2x128xf32>
    %117 = vector.broadcast %1 : vector<1x128xf32> to vector<2x128xf32>
    %118 = arith.addf %116, %117 : vector<2x128xf32>
    %119 = arith.mulf %113, %118 : vector<2x128xf32>
    %120 = arith.addf %115, %119 : vector<2x128xf32>
    %121 = math.tanh %120 : vector<2x128xf32>
    %cst_32 = arith.constant 1.000000e+00 : f32
    %122 = vector.broadcast %cst_32 : f32 to vector<2x128xf32>
    %123 = arith.subf %122, %114 : vector<2x128xf32>
    %124 = arith.mulf %123, %121 : vector<2x128xf32>
    %125 = arith.mulf %114, %102 : vector<2x128xf32>
    %126 = arith.addf %124, %125 : vector<2x128xf32>
    %c3 = arith.constant 3 : index
    %c0_33 = arith.constant 0 : index
    %c0_34 = arith.constant 0 : index
    %127 = vector.load %arg8[%c3, %c0_33, %c0_34] : memref<8x2x128xf32, #tpu.memory_space<vmem>>, vector<1x2x128xf32>
    %128 = vector.shape_cast %127 : vector<1x2x128xf32> to vector<2x128xf32>
    %129 = vector.shape_cast %126 : vector<2x128xf32> to vector<1x2x128xf32>
    tpu.vector_store %arg8[%c3, %c0_33, %c0_34], %129 {strides = array<i32>} : memref<8x2x128xf32, #tpu.memory_space<vmem>>, vector<1x2x128xf32>,
    %130 = vector.extract_strided_slice %2 {offsets = [4, 0, 0], sizes = [1, 2, 128], strides = [1, 1, 1]} : vector<8x2x128xf32> to vector<1x2x128xf32>
    %131 = vector.shape_cast %130 : vector<1x2x128xf32> to vector<2x128xf32>
    %132 = arith.mulf %126, %131 : vector<2x128xf32>
    %133 = vector.extract_strided_slice %8 {offsets = [8, 0], sizes = [2, 384], strides = [1, 1]} : vector<16x384xf32> to vector<2x384xf32>
    %cst_35 = arith.constant dense<0.000000e+00> : vector<2x384xf32>
    %134 = tpu.matmul %132, %0, %cst_35 {dimension_numbers = #tpu.dot_dimension_numbers<[1], [0], [0], [1], [0, 0, 1, 1], [], []>} : vector<2x128xf32>, vector<128x384xf32>, vector<2x384xf32> -> vector<2x384xf32>
    %135 = vector.extract_strided_slice %133 {offsets = [0, 0], sizes = [2, 256], strides = [1, 1]} : vector<2x384xf32> to vector<2x256xf32>
    %136 = vector.extract_strided_slice %134 {offsets = [0, 0], sizes = [2, 256], strides = [1, 1]} : vector<2x384xf32> to vector<2x256xf32>
    %137 = arith.addf %135, %136 : vector<2x256xf32>
    %138 = arith.negf %137 : vector<2x256xf32>
    %139 = math.exp %138 : vector<2x256xf32>
    %cst_36 = arith.constant 1.000000e+00 : f32
    %140 = vector.broadcast %cst_36 : f32 to vector<2x256xf32>
    %141 = arith.addf %140, %139 : vector<2x256xf32>
    %142 = arith.divf %140, %141 : vector<2x256xf32>
    %143 = vector.extract_strided_slice %142 {offsets = [0, 0], sizes = [2, 128], strides = [1, 1]} : vector<2x256xf32> to vector<2x128xf32>
    %144 = vector.extract_strided_slice %142 {offsets = [0, 128], sizes = [2, 128], strides = [1, 1]} : vector<2x256xf32> to vector<2x128xf32>
    %145 = vector.extract_strided_slice %133 {offsets = [0, 256], sizes = [2, 128], strides = [1, 1]} : vector<2x384xf32> to vector<2x128xf32>
    %146 = vector.extract_strided_slice %134 {offsets = [0, 256], sizes = [2, 128], strides = [1, 1]} : vector<2x384xf32> to vector<2x128xf32>
    %147 = vector.broadcast %1 : vector<1x128xf32> to vector<2x128xf32>
    %148 = arith.addf %146, %147 : vector<2x128xf32>
    %149 = arith.mulf %143, %148 : vector<2x128xf32>
    %150 = arith.addf %145, %149 : vector<2x128xf32>
    %151 = math.tanh %150 : vector<2x128xf32>
    %cst_37 = arith.constant 1.000000e+00 : f32
    %152 = vector.broadcast %cst_37 : f32 to vector<2x128xf32>
    %153 = arith.subf %152, %144 : vector<2x128xf32>
    %154 = arith.mulf %153, %151 : vector<2x128xf32>
    %155 = arith.mulf %144, %132 : vector<2x128xf32>
    %156 = arith.addf %154, %155 : vector<2x128xf32>
    %c4 = arith.constant 4 : index
    %c0_38 = arith.constant 0 : index
    %c0_39 = arith.constant 0 : index
    %157 = vector.load %arg8[%c4, %c0_38, %c0_39] : memref<8x2x128xf32, #tpu.memory_space<vmem>>, vector<1x2x128xf32>
    %158 = vector.shape_cast %157 : vector<1x2x128xf32> to vector<2x128xf32>
    %159 = vector.shape_cast %156 : vector<2x128xf32> to vector<1x2x128xf32>
    tpu.vector_store %arg8[%c4, %c0_38, %c0_39], %159 {strides = array<i32>} : memref<8x2x128xf32, #tpu.memory_space<vmem>>, vector<1x2x128xf32>,
    %160 = vector.extract_strided_slice %2 {offsets = [5, 0, 0], sizes = [1, 2, 128], strides = [1, 1, 1]} : vector<8x2x128xf32> to vector<1x2x128xf32>
    %161 = vector.shape_cast %160 : vector<1x2x128xf32> to vector<2x128xf32>
    %162 = arith.mulf %156, %161 : vector<2x128xf32>
    %163 = vector.extract_strided_slice %8 {offsets = [10, 0], sizes = [2, 384], strides = [1, 1]} : vector<16x384xf32> to vector<2x384xf32>
    %cst_40 = arith.constant dense<0.000000e+00> : vector<2x384xf32>
    %164 = tpu.matmul %162, %0, %cst_40 {dimension_numbers = #tpu.dot_dimension_numbers<[1], [0], [0], [1], [0, 0, 1, 1], [], []>} : vector<2x128xf32>, vector<128x384xf32>, vector<2x384xf32> -> vector<2x384xf32>
    %165 = vector.extract_strided_slice %163 {offsets = [0, 0], sizes = [2, 256], strides = [1, 1]} : vector<2x384xf32> to vector<2x256xf32>
    %166 = vector.extract_strided_slice %164 {offsets = [0, 0], sizes = [2, 256], strides = [1, 1]} : vector<2x384xf32> to vector<2x256xf32>
    %167 = arith.addf %165, %166 : vector<2x256xf32>
    %168 = arith.negf %167 : vector<2x256xf32>
    %169 = math.exp %168 : vector<2x256xf32>
    %cst_41 = arith.constant 1.000000e+00 : f32
    %170 = vector.broadcast %cst_41 : f32 to vector<2x256xf32>
    %171 = arith.addf %170, %169 : vector<2x256xf32>
    %172 = arith.divf %170, %171 : vector<2x256xf32>
    %173 = vector.extract_strided_slice %172 {offsets = [0, 0], sizes = [2, 128], strides = [1, 1]} : vector<2x256xf32> to vector<2x128xf32>
    %174 = vector.extract_strided_slice %172 {offsets = [0, 128], sizes = [2, 128], strides = [1, 1]} : vector<2x256xf32> to vector<2x128xf32>
    %175 = vector.extract_strided_slice %163 {offsets = [0, 256], sizes = [2, 128], strides = [1, 1]} : vector<2x384xf32> to vector<2x128xf32>
    %176 = vector.extract_strided_slice %164 {offsets = [0, 256], sizes = [2, 128], strides = [1, 1]} : vector<2x384xf32> to vector<2x128xf32>
    %177 = vector.broadcast %1 : vector<1x128xf32> to vector<2x128xf32>
    %178 = arith.addf %176, %177 : vector<2x128xf32>
    %179 = arith.mulf %173, %178 : vector<2x128xf32>
    %180 = arith.addf %175, %179 : vector<2x128xf32>
    %181 = math.tanh %180 : vector<2x128xf32>
    %cst_42 = arith.constant 1.000000e+00 : f32
    %182 = vector.broadcast %cst_42 : f32 to vector<2x128xf32>
    %183 = arith.subf %182, %174 : vector<2x128xf32>
    %184 = arith.mulf %183, %181 : vector<2x128xf32>
    %185 = arith.mulf %174, %162 : vector<2x128xf32>
    %186 = arith.addf %184, %185 : vector<2x128xf32>
    %c5 = arith.constant 5 : index
    %c0_43 = arith.constant 0 : index
    %c0_44 = arith.constant 0 : index
    %187 = vector.load %arg8[%c5, %c0_43, %c0_44] : memref<8x2x128xf32, #tpu.memory_space<vmem>>, vector<1x2x128xf32>
    %188 = vector.shape_cast %187 : vector<1x2x128xf32> to vector<2x128xf32>
    %189 = vector.shape_cast %186 : vector<2x128xf32> to vector<1x2x128xf32>
    tpu.vector_store %arg8[%c5, %c0_43, %c0_44], %189 {strides = array<i32>} : memref<8x2x128xf32, #tpu.memory_space<vmem>>, vector<1x2x128xf32>,
    %190 = vector.extract_strided_slice %2 {offsets = [6, 0, 0], sizes = [1, 2, 128], strides = [1, 1, 1]} : vector<8x2x128xf32> to vector<1x2x128xf32>
    %191 = vector.shape_cast %190 : vector<1x2x128xf32> to vector<2x128xf32>
    %192 = arith.mulf %186, %191 : vector<2x128xf32>
    %193 = vector.extract_strided_slice %8 {offsets = [12, 0], sizes = [2, 384], strides = [1, 1]} : vector<16x384xf32> to vector<2x384xf32>
    %cst_45 = arith.constant dense<0.000000e+00> : vector<2x384xf32>
    %194 = tpu.matmul %192, %0, %cst_45 {dimension_numbers = #tpu.dot_dimension_numbers<[1], [0], [0], [1], [0, 0, 1, 1], [], []>} : vector<2x128xf32>, vector<128x384xf32>, vector<2x384xf32> -> vector<2x384xf32>
    %195 = vector.extract_strided_slice %193 {offsets = [0, 0], sizes = [2, 256], strides = [1, 1]} : vector<2x384xf32> to vector<2x256xf32>
    %196 = vector.extract_strided_slice %194 {offsets = [0, 0], sizes = [2, 256], strides = [1, 1]} : vector<2x384xf32> to vector<2x256xf32>
    %197 = arith.addf %195, %196 : vector<2x256xf32>
    %198 = arith.negf %197 : vector<2x256xf32>
    %199 = math.exp %198 : vector<2x256xf32>
    %cst_46 = arith.constant 1.000000e+00 : f32
    %200 = vector.broadcast %cst_46 : f32 to vector<2x256xf32>
    %201 = arith.addf %200, %199 : vector<2x256xf32>
    %202 = arith.divf %200, %201 : vector<2x256xf32>
    %203 = vector.extract_strided_slice %202 {offsets = [0, 0], sizes = [2, 128], strides = [1, 1]} : vector<2x256xf32> to vector<2x128xf32>
    %204 = vector.extract_strided_slice %202 {offsets = [0, 128], sizes = [2, 128], strides = [1, 1]} : vector<2x256xf32> to vector<2x128xf32>
    %205 = vector.extract_strided_slice %193 {offsets = [0, 256], sizes = [2, 128], strides = [1, 1]} : vector<2x384xf32> to vector<2x128xf32>
    %206 = vector.extract_strided_slice %194 {offsets = [0, 256], sizes = [2, 128], strides = [1, 1]} : vector<2x384xf32> to vector<2x128xf32>
    %207 = vector.broadcast %1 : vector<1x128xf32> to vector<2x128xf32>
    %208 = arith.addf %206, %207 : vector<2x128xf32>
    %209 = arith.mulf %203, %208 : vector<2x128xf32>
    %210 = arith.addf %205, %209 : vector<2x128xf32>
    %211 = math.tanh %210 : vector<2x128xf32>
    %cst_47 = arith.constant 1.000000e+00 : f32
    %212 = vector.broadcast %cst_47 : f32 to vector<2x128xf32>
    %213 = arith.subf %212, %204 : vector<2x128xf32>
    %214 = arith.mulf %213, %211 : vector<2x128xf32>
    %215 = arith.mulf %204, %192 : vector<2x128xf32>
    %216 = arith.addf %214, %215 : vector<2x128xf32>
    %c6 = arith.constant 6 : index
    %c0_48 = arith.constant 0 : index
    %c0_49 = arith.constant 0 : index
    %217 = vector.load %arg8[%c6, %c0_48, %c0_49] : memref<8x2x128xf32, #tpu.memory_space<vmem>>, vector<1x2x128xf32>
    %218 = vector.shape_cast %217 : vector<1x2x128xf32> to vector<2x128xf32>
    %219 = vector.shape_cast %216 : vector<2x128xf32> to vector<1x2x128xf32>
    tpu.vector_store %arg8[%c6, %c0_48, %c0_49], %219 {strides = array<i32>} : memref<8x2x128xf32, #tpu.memory_space<vmem>>, vector<1x2x128xf32>,
    %220 = vector.extract_strided_slice %2 {offsets = [7, 0, 0], sizes = [1, 2, 128], strides = [1, 1, 1]} : vector<8x2x128xf32> to vector<1x2x128xf32>
    %221 = vector.shape_cast %220 : vector<1x2x128xf32> to vector<2x128xf32>
    %222 = arith.mulf %216, %221 : vector<2x128xf32>
    %223 = vector.extract_strided_slice %8 {offsets = [14, 0], sizes = [2, 384], strides = [1, 1]} : vector<16x384xf32> to vector<2x384xf32>
    %cst_50 = arith.constant dense<0.000000e+00> : vector<2x384xf32>
    %224 = tpu.matmul %222, %0, %cst_50 {dimension_numbers = #tpu.dot_dimension_numbers<[1], [0], [0], [1], [0, 0, 1, 1], [], []>} : vector<2x128xf32>, vector<128x384xf32>, vector<2x384xf32> -> vector<2x384xf32>
    %225 = vector.extract_strided_slice %223 {offsets = [0, 0], sizes = [2, 256], strides = [1, 1]} : vector<2x384xf32> to vector<2x256xf32>
    %226 = vector.extract_strided_slice %224 {offsets = [0, 0], sizes = [2, 256], strides = [1, 1]} : vector<2x384xf32> to vector<2x256xf32>
    %227 = arith.addf %225, %226 : vector<2x256xf32>
    %228 = arith.negf %227 : vector<2x256xf32>
    %229 = math.exp %228 : vector<2x256xf32>
    %cst_51 = arith.constant 1.000000e+00 : f32
    %230 = vector.broadcast %cst_51 : f32 to vector<2x256xf32>
    %231 = arith.addf %230, %229 : vector<2x256xf32>
    %232 = arith.divf %230, %231 : vector<2x256xf32>
    %233 = vector.extract_strided_slice %232 {offsets = [0, 0], sizes = [2, 128], strides = [1, 1]} : vector<2x256xf32> to vector<2x128xf32>
    %234 = vector.extract_strided_slice %232 {offsets = [0, 128], sizes = [2, 128], strides = [1, 1]} : vector<2x256xf32> to vector<2x128xf32>
    %235 = vector.extract_strided_slice %223 {offsets = [0, 256], sizes = [2, 128], strides = [1, 1]} : vector<2x384xf32> to vector<2x128xf32>
    %236 = vector.extract_strided_slice %224 {offsets = [0, 256], sizes = [2, 128], strides = [1, 1]} : vector<2x384xf32> to vector<2x128xf32>
    %237 = vector.broadcast %1 : vector<1x128xf32> to vector<2x128xf32>
    %238 = arith.addf %236, %237 : vector<2x128xf32>
    %239 = arith.mulf %233, %238 : vector<2x128xf32>
    %240 = arith.addf %235, %239 : vector<2x128xf32>
    %241 = math.tanh %240 : vector<2x128xf32>
    %cst_52 = arith.constant 1.000000e+00 : f32
    %242 = vector.broadcast %cst_52 : f32 to vector<2x128xf32>
    %243 = arith.subf %242, %234 : vector<2x128xf32>
    %244 = arith.mulf %243, %241 : vector<2x128xf32>
    %245 = arith.mulf %234, %222 : vector<2x128xf32>
    %246 = arith.addf %244, %245 : vector<2x128xf32>
    %c7 = arith.constant 7 : index
    %c0_53 = arith.constant 0 : index
    %c0_54 = arith.constant 0 : index
    %247 = vector.load %arg8[%c7, %c0_53, %c0_54] : memref<8x2x128xf32, #tpu.memory_space<vmem>>, vector<1x2x128xf32>
    %248 = vector.shape_cast %247 : vector<1x2x128xf32> to vector<2x128xf32>
    %249 = vector.shape_cast %246 : vector<2x128xf32> to vector<1x2x128xf32>
    tpu.vector_store %arg8[%c7, %c0_53, %c0_54], %249 {strides = array<i32>} : memref<8x2x128xf32, #tpu.memory_space<vmem>>, vector<1x2x128xf32>,
    %c0_55 = arith.constant 0 : index
    %c0_56 = arith.constant 0 : index
    %250 = vector.load %arg9[%c0_55, %c0_56] : memref<2x128xf32, #tpu.memory_space<vmem>>, vector<2x128xf32>
    tpu.vector_store %arg9[%c0_55, %c0_56], %246 {strides = array<i32>} : memref<2x128xf32, #tpu.memory_space<vmem>>, vector<2x128xf32>,
    return
  }
  func.func @transform_0(%arg0: i32) -> (i32, i32) {
    %c0_i32 = arith.constant 0 : i32
    %c0_i32_0 = arith.constant 0 : i32
    %c0_i32_1 = arith.constant 0 : i32
    return %c0_i32, %c0_i32_0 : i32, i32
  }
  func.func @transform_1(%arg0: i32) -> (i32, i32) {
    %c0_i32 = arith.constant 0 : i32
    %c0_i32_0 = arith.constant 0 : i32
    %c0_i32_1 = arith.constant 0 : i32
    return %c0_i32, %c0_i32_0 : i32, i32
  }
  func.func @transform_2(%arg0: i32) -> (i32, i32, i32) {
    %c0_i32 = arith.constant 0 : i32
    %c0_i32_0 = arith.constant 0 : i32
    %c0_i32_1 = arith.constant 0 : i32
    %c0_i32_2 = arith.constant 0 : i32
    return %c0_i32, %c0_i32_0, %c0_i32_1 : i32, i32, i32
  }
  func.func @transform_3(%arg0: i32) -> (i32, i32) {
    %c0_i32 = arith.constant 0 : i32
    %c0_i32_0 = arith.constant 0 : i32
    %c0_i32_1 = arith.constant 0 : i32
    return %c0_i32, %c0_i32_0 : i32, i32
  }
  func.func @transform_4(%arg0: i32) -> (i32, i32) {
    %c0_i32 = arith.constant 0 : i32
    %c0_i32_0 = arith.constant 0 : i32
    %c0_i32_1 = arith.constant 0 : i32
    return %c0_i32, %c0_i32_0 : i32, i32
  }
  func.func @transform_5(%arg0: i32) -> (i32, i32) {
    %c0_i32 = arith.constant 0 : i32
    %c0_i32_0 = arith.constant 0 : i32
    %c0_i32_1 = arith.constant 0 : i32
    return %c0_i32, %c0_i32_0 : i32, i32
  }
  func.func @transform_6(%arg0: i32) -> (i32, i32) {
    %c0_i32 = arith.constant 0 : i32
    %c0_i32_0 = arith.constant 0 : i32
    %c0_i32_1 = arith.constant 0 : i32
    return %c0_i32, %c0_i32_0 : i32, i32
  }
  func.func @transform_7(%arg0: i32) -> (i32, i32, i32) {
    %c0_i32 = arith.constant 0 : i32
    %c0_i32_0 = arith.constant 0 : i32
    %c0_i32_1 = arith.constant 0 : i32
    %c0_i32_2 = arith.constant 0 : i32
    return %c0_i32, %c0_i32_0, %c0_i32_1 : i32, i32, i32
  }
  func.func @transform_8(%arg0: i32) -> (i32, i32) {
    %c0_i32 = arith.constant 0 : i32
    %c0_i32_0 = arith.constant 0 : i32
    %c0_i32_1 = arith.constant 0 : i32
    return %c0_i32, %c0_i32_0 : i32, i32
  }
}

</mosaic_0001>

<bundles_post_ra>
// kernel: tpu_custom_call.1
= control target key start
LH: loop header
LB: loop body
LE: loop exit
PB: predicated region body
PF: predicated region fallthrough
CT: control target
= control target key end

     0   :  { %14 = vsyncpa [#allocation3], 0  ;;  %s2386_s0 = inlined_call_operand.hbm [shape: f32[16,16], index: 0, kind: input, shape index: {}]   ;;  %s2387_s1 = inlined_call_operand.hbm [shape: f32[2,128], index: 1, kind: input, shape index: {}]   ;;  %s2388_s2 = inlined_call_operand.hbm [shape: f32[8,2,128], index: 2, kind: input, shape index: {}]   ;;  %s2389_s3 = inlined_call_operand.hbm [shape: f32[16,384], index: 3, kind: input, shape index: {}]   ;;  %s2390_s4 = inlined_call_operand.hbm [shape: f32[128,384], index: 4, kind: input, shape index: {}]   ;;  %s2391_s5 = inlined_call_operand.vmem [shape: f32[1,384], index: 5, kind: input, shape index: {}]   ;;  %s2392_s6 = inlined_call_operand.vmem [shape: f32[1,128], index: 6, kind: input, shape index: {}]   ;;  %s2393_s7 = inlined_call_operand.hbm [shape: f32[8,2,128], index: 7, kind: output, shape index: {0}]   ;;  %s2394_s8 = inlined_call_operand.hbm [shape: f32[2,128], index: 8, kind: output, shape index: {1}]  }
   0x1   :  { %15 = vsyncpa [#allocation6], 0 }
   0x2   :  { %16 = vsyncpa [#allocation9], 0 }
   0x3   :  { %17 = vsyncpa [#allocation4], 0  ;;  %s37_s29 = sshll.u32 %s2387_s1, 4  ;;  %s38_s29 = int_to_ptr.hbm [resolvable:$true] %s37_s29 }
   0x4   :  { %18 = vsyncpa [#allocation13], 0  ;;  %s1625_s30 = smov [#allocation5]   ;;  %s60_s12 = sshll.u32 %s2389_s3, 4  ;;  %s61_s12 = int_to_ptr.hbm [resolvable:$true] %s60_s12 }
   0x5   :  { %s39_s9 = sshll.u32 %s1625_s30, 4  ;;  %s1626_s13 = smov [#allocation8]   ;;  %s40_s9 = int_to_ptr.vmem [resolvable:$true] %s39_s9 }
   0x6   :  { %42 = dma.hbm_to_vmem [thread:$0]  %s38_s29, 32, %s40_s9, [#allocation6]  }
   0x7   :  { %s62_s14 = sshll.u32 %s1626_s13, 4  ;;  %s1627_s15 = smov 384   ;;  %s63_s14 = int_to_ptr.vmem [resolvable:$true] %s62_s14 }
   0x8   :  { %s1628_s16 = smov 24   ;;  %s23_s1 = sshll.u32 %s2386_s0, 4  ;;  %s24_s1 = int_to_ptr.hbm [resolvable:$true] %s23_s1 }
   0x9   :  { %68 = dma.hbm_to_vmem [thread:$0]  %s61_s12, 768, %s63_s14, [#allocation9], %s1627_s15, %s1627_s15, %s1628_s16  }
   0xa   :  { %s1629_s19 = smov [#allocation2]   ;;  %s47_s3 = sshll.u32 %s2388_s2, 4  ;;  %s48_s3 = int_to_ptr.hbm [resolvable:$true] %s47_s3 }
   0xb   :  { %s25_s20 = sshll.u32 %s1629_s19, 4  ;;  %s1630_s23 = smov 128   ;;  %s26_s20 = int_to_ptr.vmem [resolvable:$true] %s25_s20 }
   0xc   :  { %s1631_s24 = smov 8   ;;  %s1632_s25 = smov [#allocation7]  }
   0xd   :  { %31 = dma.hbm_to_vmem [thread:$0]  %s24_s1, 256, %s26_s20, [#allocation3], %s1630_s23, %s1630_s23, %s1631_s24  }
   0xe   :  { %s49_s26 = sshll.u32 %s1632_s25, 4  ;;  %s1633_s27 = smov 32   ;;  %s50_s26 = int_to_ptr.vmem [resolvable:$true] %s49_s26 }
   0xf   :  { %s1634_s28 = smov 2   ;;  %s73_s30 = sshll.u32 %s2390_s4, 4  ;;  %s74_s30 = int_to_ptr.hbm [resolvable:$true] %s73_s30 }
  0x10   :  { %55 = dma.hbm_to_vmem [thread:$0]  %s48_s3, 256, %s50_s26, [#allocation6], %s1633_s27, %s1633_s27, %s1634_s28  }
  0x11   :  { %s1635_s9 = smov [#allocation10]  }
  0x12   :  { %s75_s2 = sshll.u32 %s1635_s9, 4  ;;  %s76_s2 = int_to_ptr.vmem [resolvable:$true] %s75_s2 }
  0x13   :  { %81 = dma.hbm_to_vmem [thread:$0]  %s74_s30, 6144, %s76_s2, [#allocation9], %s1627_s15, %s1627_s15, %s1628_s16  }
  0x14   :  { %1615 = dma.done.wait [#allocation3], 256  }
  0x15   :  { %1616 = vsyncadd [#allocation3], 4294967040 }
  0x16   :  { %1617 = dma.done.wait [#allocation6], 288  }
  0x17   :  { %1618 = vsyncadd [#allocation6], 4294967008 }
  0x18   :  { %1619 = dma.done.wait [#allocation9], 6912  }
  0x19   :  { %1620 = vsyncadd [#allocation9], 4294960384  ;;  %v168_v0 = vld [vmem:[#allocation8 + $0x18] sm:$0xff]  ;;  %v165_v2 = vld [vmem:[#allocation8] sm:$0xff]  ;;  %vm179_vm0 = vcmask 130048   ;;  %s1251_s17 = sshll.u32 %s2393_s7, 4  ;;  %s1252_s17 = int_to_ptr.hbm [resolvable:$true] %s1251_s17 }
  0x1a   :  { %v1701_v1 = vld [vmem:[#allocation10 + $0x168] sm:$0xff]  ;;  %200 = vmatpush.msra.mxu0 %v168_v0  ;;  %v1704_v3 = vld [vmem:[#allocation10 + $0x150] sm:$0xff]  ;;  %v1708_v5 = vld [vmem:[#allocation10 + $0x138] sm:$0xff]  ;;  %s1637_s18 = smov [#allocation12]   ;;  %s1265_s21 = sshll.u32 %s2394_s8, 4  ;;  %s1266_s21 = int_to_ptr.hbm [resolvable:$true] %s1265_s21 }
  0x1b   :  { %257 = vmatpush.msra.mxu3 %v1701_v1  ;;  %v1706_v4 = vld [vmem:[#allocation10 + $0x170] sm:$0xff]  ;;  %v1711_v6 = vld [vmem:[#allocation10 + $0x158] sm:$0xff]  ;;  %v1714_v7 = vld [vmem:[#allocation10 + $0x120] sm:$0xff]  ;;  %s1263_s1 = sshll.u32 %s1637_s18, 4  ;;  %s1264_s1 = int_to_ptr.vmem [resolvable:$true] %s1263_s1 }
  0x1c   :  { %201 = vmatpush.msra.mxu0 %v165_v2  ;;  %v1717_v8 = vld [vmem:[#allocation10 + $0x140] sm:$0xff]  ;;  %v1720_v9 = vld [vmem:[#allocation10 + $0x108] sm:$0xff]  ;;  %v1730_v12 = vld [vmem:[#allocation10 + $0xf0] sm:$0xff] }
  0x1d   :  { %258 = vmatpush.msra.mxu3 %v1704_v3  ;;  %v1722_v10 = vld [vmem:[#allocation2] sm:$0xff]  ;;  %v1736_v14 = vld [vmem:[#allocation10 + $0xd8] sm:$0xff]  ;;  %v1742_v18 = vld [vmem:[#allocation10 + $0xc0] sm:$0xff] }
  0x1e   :  { %277 = vmatpush.msrb.mxu0 %v1706_v4  ;;  %v1725_v11 = vld [vmem:[#allocation10 + $0x128] sm:$0xff]  ;;  %v1733_v13 = vld [vmem:[#allocation10 + $0x110] sm:$0xff]  ;;  %v1739_v16 = vld [vmem:[#allocation10 + $0xf8] sm:$0xff] }
  0x1f   :  { %259 = vmatpush.msra.mxu3 %v1708_v5  ;;  %1282 = vmatmul.msk.f32.vlgmr.msra.gmra.mxu0 %vm179_vm0, %v1722_v10  ;;  %v169_v15 = vld [vmem:[#allocation8 + $0x20] sm:$0xff]  ;;  %v166_v17 = vld [vmem:[#allocation8 + $0x8] sm:$0xff]  ;;  %v1747_v20 = vld [vmem:[#allocation10 + $0xe0] sm:$0xff] }
  0x20   :  { %278 = vmatpush.msrb.mxu0 %v1711_v6  ;;  %223 = vmatpush.msra.mxu1 %v169_v15  ;;  %v1744_v19 = vld [vmem:[#allocation2 + $0x8] sm:$0xff]  ;;  %v1752_v22 = vld [vmem:[#allocation10 + $0xa8] sm:$0xff]  ;;  %v1761_v24 = vld [vmem:[#allocation10 + $0x160] sm:$0xff] }
  0x21   :  { %260 = vmatpush.msra.mxu3 %v1714_v7  ;;  %v1749_v21 = vld [vmem:[#allocation10 + $0x178] sm:$0xff]  ;;  %v1757_v23 = vld [vmem:[#allocation10 + $0xc8] sm:$0xff]  ;;  %v1764_v25 = vld [vmem:[#allocation10 + $0x90] sm:$0xff] }
  0x22   :  { %279 = vmatpush.msrb.mxu0 %v1717_v8  ;;  %224 = vmatpush.msra.mxu1 %v166_v17  ;;  %v1768_v26 = vld [vmem:[#allocation10 + $0xb0] sm:$0xff]  ;;  %v1770_v27 = vld [vmem:[#allocation10 + $0x148] sm:$0xff]  ;;  %v170_v28 = vld [vmem:[#allocation8 + $0x28] sm:$0xff] }
  0x23   :  { %261 = vmatpush.msra.mxu3 %v1720_v9  ;;  %1284 = vmatmul.msk.f32.vlgmr.msra.gmra.mxu1 %vm179_vm0, %v1722_v10  ;;  %v1773_v29 = vld [vmem:[#allocation10 + $0x78] sm:$0xff]  ;;  %v167_v30 = vld [vmem:[#allocation8 + $0x10] sm:$0xff]  ;;  %v1779_v32 = vld [vmem:[#allocation10 + $0x130] sm:$0xff] }
  0x24   :  { %280 = vmatpush.msrb.mxu0 %v1725_v11  ;;  %297 = vmatpush.msrb.mxu1 %v1749_v21  ;;  %v1777_v31 = vld [vmem:[#allocation10 + $0x98] sm:$0xff]  ;;  %v1782_v33 = vld [vmem:[#allocation10 + $0x60] sm:$0xff]  ;;  %v1791_v36 = vld [vmem:[#allocation10 + $0x48] sm:$0xff] }
  0x25   :  { %262 = vmatpush.msra.mxu3 %v1730_v12  ;;  %246 = vmatpush.msra.mxu2 %v170_v28  ;;  %v1786_v34 = vld [vmem:[#allocation10 + $0x80] sm:$0xff]  ;;  %v1788_v35 = vld [vmem:[#allocation10 + $0x118] sm:$0xff]  ;;  %v1795_v37 = vld [vmem:[#allocation10 + $0x68] sm:$0xff] }
  0x26   :  { %281 = vmatpush.msrb.mxu0 %v1733_v13  ;;  %298 = vmatpush.msrb.mxu1 %v1761_v24  ;;  %v1797_v38 = vld [vmem:[#allocation10 + $0x100] sm:$0xff]  ;;  %v1802_v39 = vld [vmem:[#allocation10 + $0x30] sm:$0xff]  ;;  %v255_v42 = vld [vmem:[#allocation5] sm:$0x3] }
  0x27   :  { %263 = vmatpush.msra.mxu3 %v1736_v14  ;;  %1283 = vmatmul.msk.f32.gmra.mxu0 %vm179_vm0, %v1744_v19  ;;  %2423 = vst [vmem:[#allocation19_spill] sm:$0xff] %v1802_v39  ;;  %v1804_v40 = vld [vmem:[#allocation10 + $0x50] sm:$0xff]  ;;  %v155_v41 = vld [vmem:[#allocation7] sm:$0x3]  ;;  %v1808_v43 = vld [vmem:[#allocation10 + $0xe8] sm:$0xff] }
  0x28   :  { %282 = vmatpush.msrb.mxu0 %v1739_v16  ;;  %299 = vmatpush.msrb.mxu1 %v1770_v27  ;;  %v1813_v44 = vld [vmem:[#allocation10 + $0x18] sm:$0xff]  ;;  %v1819_v46 = vld [vmem:[#allocation10 + $0xd0] sm:$0xff]  ;;  %v1823_v47 = vld [vmem:[#allocation10] sm:$0xff]  ;;  %v1825_v48 = vmul.f32 %v255_v42, %v155_v41 }
  0x29   :  { %264 = vmatpush.msra.mxu3 %v1742_v18  ;;  %247 = vmatpush.msra.mxu2 %v167_v30  ;;  %2424 = vst [vmem:[#allocation20_spill] sm:$0xff] %v1813_v44  ;;  %v1817_v45 = vld [vmem:[#allocation10 + $0x38] sm:$0xff]  ;;  %v1829_v49 = vld [vmem:[#allocation10 + $0x20] sm:$0xff]  ;;  %v1837_v51 = vld [vmem:[#allocation10 + $0x8] sm:$0xff] }
  0x2a   :  { %283 = vmatpush.msrb.mxu0 %v1747_v20  ;;  %300 = vmatpush.msrb.mxu1 %v1779_v32  ;;  %2425 = vst [vmem:[#allocation21_spill] sm:$0xff] %v1817_v45  ;;  %v1834_v50 = vld [vmem:[#allocation10 + $0xb8] sm:$0xff]  ;;  %v1842_v52 = vld [vmem:[#allocation10 + $0xa0] sm:$0xff]  ;;  %v1847_v53 = vld [vmem:[#allocation10 + $0x88] sm:$0xff] }
  0x2b   :  { %265 = vmatpush.msra.mxu3 %v1752_v22  ;;  %1285 = vmatmul.msk.f32.gmra.mxu1 %vm179_vm0, %v1744_v19  ;;  %2426 = vst [vmem:[#allocation22_spill] sm:$0xff] %v1823_v47  ;;  %v1852_v54 = vld [vmem:[#allocation10 + $0x70] sm:$0xff]  ;;  %v1858_v55 = vld [vmem:[#allocation10 + $0x58] sm:$0xff]  ;;  %v1864_v56 = vld [vmem:[#allocation10 + $0x40] sm:$0xff] }
  0x2c   :  { %284 = vmatpush.msrb.mxu0 %v1757_v23  ;;  %301 = vmatpush.msrb.mxu1 %v1788_v35  ;;  %2427 = vst [vmem:[#allocation23_spill] sm:$0xff] %v1829_v49  ;;  %v1870_v57 = vld [vmem:[#allocation10 + $0x28] sm:$0xff]  ;;  %v1876_v58 = vld [vmem:[#allocation10 + $0x10] sm:$0xff] }
  0x2d   :  { %266 = vmatpush.msra.mxu3 %v1764_v25  ;;  %1286 = vmatmul.msk.f32.vlgmr.msra.gmra.mxu2 %vm179_vm0, %v1722_v10  ;;  %2428 = vst [vmem:[#allocation24_spill] sm:$0xff] %v1837_v51  ;;  %v1997_v60 = vld [vmem:[%s2391_s5] sm:$0x7] }
  0x2e   :  { %285 = vmatpush.msrb.mxu0 %v1768_v26  ;;  %302 = vmatpush.msrb.mxu1 %v1797_v38  ;;  %2429 = vst [vmem:[#allocation25_spill] sm:$0xff] %v1864_v56  ;;  %v173_v61 = vperm.slane %v1997_v60, 0  ;;  %v174_v2 = vperm.slane %v1997_v60, 1 }
  0x2f   :  { %267 = vmatpush.msra.mxu3 %v1773_v29  ;;  %370 = vmatpush.msrb.mxu2 %v1701_v1  ;;  %2430 = vst [vmem:[#allocation26_spill] sm:$0xff] %v1870_v57 }
  0x30   :  { %286 = vmatpush.msrb.mxu0 %v1777_v31  ;;  %303 = vmatpush.msrb.mxu1 %v1808_v43  ;;  %2431 = vst [vmem:[#allocation27_spill] sm:$0xff] %v1876_v58 }
  0x31   :  { %268 = vmatpush.msra.mxu3 %v1782_v33  ;;  %371 = vmatpush.msrb.mxu2 %v1704_v3  ;;  %2432 = vst [vmem:[#allocation28_spill] sm:$0xff] %v1997_v60 }
  0x32   :  { %287 = vmatpush.msrb.mxu0 %v1786_v34  ;;  %304 = vmatpush.msrb.mxu1 %v1819_v46 }
  0x33   :  { %269 = vmatpush.msra.mxu3 %v1791_v36  ;;  %372 = vmatpush.msrb.mxu2 %v1708_v5 }
  0x34   :  { %288 = vmatpush.msrb.mxu0 %v1795_v37  ;;  %305 = vmatpush.msrb.mxu1 %v1834_v50 }
  0x35   :  { %270 = vmatpush.msra.mxu3 %v1802_v39  ;;  %373 = vmatpush.msrb.mxu2 %v1714_v7 }
  0x36   :  { %289 = vmatpush.msrb.mxu0 %v1804_v40  ;;  %306 = vmatpush.msrb.mxu1 %v1842_v52 }
  0x37   :  { %271 = vmatpush.msra.mxu3 %v1813_v44  ;;  %374 = vmatpush.msrb.mxu2 %v1720_v9 }
  0x38   :  { %290 = vmatpush.msrb.mxu0 %v1817_v45  ;;  %307 = vmatpush.msrb.mxu1 %v1847_v53 }
  0x39   :  { %272 = vmatpush.msra.mxu3 %v1823_v47  ;;  %375 = vmatpush.msrb.mxu2 %v1730_v12 }
  0x3a   :  { %273 = vmatmul.f32.vlgmr.msra.gmra.mxu3 %v1825_v48  ;;  %291 = vmatpush.msrb.mxu0 %v1829_v49 }
  0x3b   :  { %390 = vmatpush.msrb.mxu3 %v1706_v4  ;;  %308 = vmatpush.msrb.mxu1 %v1852_v54 }
  0x3c   :  { %292 = vmatpush.msrb.mxu0 %v1837_v51  ;;  %376 = vmatpush.msrb.mxu2 %v1736_v14 }
  0x3d   :  { %293 = vmatmul.f32.vlgmr.msrb.gmra.mxu0 %v1825_v48  ;;  %391 = vmatpush.msrb.mxu3 %v1711_v6 }
  0x3e   :  { %410 = vmatpush.msra.mxu0 %v1749_v21  ;;  %309 = vmatpush.msrb.mxu1 %v1858_v55 }
  0x3f   :  { %392 = vmatpush.msrb.mxu3 %v1717_v8  ;;  %377 = vmatpush.msrb.mxu2 %v1742_v18 }
  0x40   :  { %411 = vmatpush.msra.mxu0 %v1761_v24  ;;  %310 = vmatpush.msrb.mxu1 %v1864_v56 }
  0x41   :  { %393 = vmatpush.msrb.mxu3 %v1725_v11  ;;  %378 = vmatpush.msrb.mxu2 %v1752_v22 }
  0x42   :  { %412 = vmatpush.msra.mxu0 %v1770_v27  ;;  %311 = vmatpush.msrb.mxu1 %v1870_v57 }
  0x43   :  { %394 = vmatpush.msrb.mxu3 %v1733_v13  ;;  %379 = vmatpush.msrb.mxu2 %v1764_v25 }
  0x44   :  { %413 = vmatpush.msra.mxu0 %v1779_v32  ;;  %312 = vmatpush.msrb.mxu1 %v1876_v58 }
  0x45   :  { %395 = vmatpush.msrb.mxu3 %v1739_v16  ;;  %313 = vmatmul.f32.vlgmr.msrb.gmra.mxu1 %v1825_v48 }
  0x46   :  { %414 = vmatpush.msra.mxu0 %v1788_v35  ;;  %380 = vmatpush.msrb.mxu2 %v1773_v29 }
  0x47   :  { %396 = vmatpush.msrb.mxu3 %v1747_v20  ;;  %1287 = vmatmul.msk.f32.gmra.mxu2 %vm179_vm0, %v1744_v19 }
  0x48   :  { %415 = vmatpush.msra.mxu0 %v1797_v38  ;;  %381 = vmatpush.msrb.mxu2 %v1782_v33 }
  0x49   :  { %397 = vmatpush.msrb.mxu3 %v1757_v23  ;;  %499 = vmatpush.msra.mxu1 %v1701_v1 }
  0x4a   :  { %416 = vmatpush.msra.mxu0 %v1808_v43  ;;  %382 = vmatpush.msrb.mxu2 %v1791_v36 }
  0x4b   :  { %398 = vmatpush.msrb.mxu3 %v1768_v26  ;;  %500 = vmatpush.msra.mxu1 %v1704_v3 }
  0x4c   :  { %417 = vmatpush.msra.mxu0 %v1819_v46  ;;  %383 = vmatpush.msrb.mxu2 %v1802_v39 }
  0x4d   :  { %399 = vmatpush.msrb.mxu3 %v1777_v31  ;;  %501 = vmatpush.msra.mxu1 %v1708_v5 }
  0x4e   :  { %418 = vmatpush.msra.mxu0 %v1834_v50  ;;  %384 = vmatpush.msrb.mxu2 %v1813_v44 }
  0x4f   :  { %400 = vmatpush.msrb.mxu3 %v1786_v34  ;;  %502 = vmatpush.msra.mxu1 %v1714_v7 }
  0x50   :  { %419 = vmatpush.msra.mxu0 %v1842_v52  ;;  %385 = vmatpush.msrb.mxu2 %v1823_v47 }
  0x51   :  { %401 = vmatpush.msrb.mxu3 %v1795_v37  ;;  %503 = vmatpush.msra.mxu1 %v1720_v9 }
  0x52   :  { %420 = vmatpush.msra.mxu0 %v1847_v53  ;;  %519 = vmatpush.msra.mxu2 %v1706_v4 }
  0x53   :  { %402 = vmatpush.msrb.mxu3 %v1804_v40  ;;  %504 = vmatpush.msra.mxu1 %v1730_v12 }
  0x54   :  { %421 = vmatpush.msra.mxu0 %v1852_v54  ;;  %520 = vmatpush.msra.mxu2 %v1711_v6 }
  0x55   :  { %403 = vmatpush.msrb.mxu3 %v1817_v45  ;;  %505 = vmatpush.msra.mxu1 %v1736_v14 }
  0x56   :  { %422 = vmatpush.msra.mxu0 %v1858_v55  ;;  %521 = vmatpush.msra.mxu2 %v1717_v8 }
  0x57   :  { %404 = vmatpush.msrb.mxu3 %v1829_v49  ;;  %506 = vmatpush.msra.mxu1 %v1742_v18 }
  0x58   :  { %423 = vmatpush.msra.mxu0 %v1864_v56  ;;  %522 = vmatpush.msra.mxu2 %v1725_v11 }
  0x59   :  { %405 = vmatpush.msrb.mxu3 %v1837_v51  ;;  %507 = vmatpush.msra.mxu1 %v1752_v22 }
  0x5a   :  { %424 = vmatpush.msra.mxu0 %v1870_v57  ;;  %523 = vmatpush.msra.mxu2 %v1733_v13 }
  0x5b   :  { %539 = vmatpush.msra.mxu3 %v1749_v21  ;;  %508 = vmatpush.msra.mxu1 %v1764_v25 }
  0x5c   :  { %425 = vmatpush.msra.mxu0 %v1876_v58  ;;  %524 = vmatpush.msra.mxu2 %v1739_v16 }
  0x5d   :  { %540 = vmatpush.msra.mxu3 %v1761_v24  ;;  %509 = vmatpush.msra.mxu1 %v1773_v29 }
  0x5e   :  { %627 = vmatpush.msrb.mxu0 %v1701_v1  ;;  %525 = vmatpush.msra.mxu2 %v1747_v20 }
  0x5f   :  { %541 = vmatpush.msra.mxu3 %v1770_v27  ;;  %510 = vmatpush.msra.mxu1 %v1782_v33 }
  0x60   :  { %628 = vmatpush.msrb.mxu0 %v1704_v3  ;;  %526 = vmatpush.msra.mxu2 %v1757_v23 }
  0x61   :  { %542 = vmatpush.msra.mxu3 %v1779_v32  ;;  %511 = vmatpush.msra.mxu1 %v1791_v36 }
  0x62   :  { %629 = vmatpush.msrb.mxu0 %v1708_v5  ;;  %527 = vmatpush.msra.mxu2 %v1768_v26 }
  0x63   :  { %543 = vmatpush.msra.mxu3 %v1788_v35  ;;  %512 = vmatpush.msra.mxu1 %v1802_v39 }
  0x64   :  { %630 = vmatpush.msrb.mxu0 %v1714_v7  ;;  %528 = vmatpush.msra.mxu2 %v1777_v31 }
  0x65   :  { %544 = vmatpush.msra.mxu3 %v1797_v38  ;;  %513 = vmatpush.msra.mxu1 %v1813_v44 }
  0x66   :  { %631 = vmatpush.msrb.mxu0 %v1720_v9  ;;  %529 = vmatpush.msra.mxu2 %v1786_v34 }
  0x67   :  { %545 = vmatpush.msra.mxu3 %v1808_v43  ;;  %514 = vmatpush.msra.mxu1 %v1823_v47 }
  0x68   :  { %632 = vmatpush.msrb.mxu0 %v1730_v12  ;;  %530 = vmatpush.msra.mxu2 %v1795_v37 }
  0x69   :  { %546 = vmatpush.msra.mxu3 %v1819_v46  ;;  %647 = vmatpush.msrb.mxu1 %v1706_v4 }
  0x6a   :  { %633 = vmatpush.msrb.mxu0 %v1736_v14  ;;  %531 = vmatpush.msra.mxu2 %v1804_v40 }
  0x6b   :  { %547 = vmatpush.msra.mxu3 %v1834_v50  ;;  %648 = vmatpush.msrb.mxu1 %v1711_v6 }
  0x6c   :  { %634 = vmatpush.msrb.mxu0 %v1742_v18  ;;  %532 = vmatpush.msra.mxu2 %v1817_v45 }
  0x6d   :  { %548 = vmatpush.msra.mxu3 %v1842_v52  ;;  %649 = vmatpush.msrb.mxu1 %v1717_v8 }
  0x6e   :  { %635 = vmatpush.msrb.mxu0 %v1752_v22  ;;  %533 = vmatpush.msra.mxu2 %v1829_v49 }
  0x6f   :  { %549 = vmatpush.msra.mxu3 %v1847_v53  ;;  %650 = vmatpush.msrb.mxu1 %v1725_v11 }
  0x70   :  { %636 = vmatpush.msrb.mxu0 %v1764_v25  ;;  %534 = vmatpush.msra.mxu2 %v1837_v51 }
  0x71   :  { %550 = vmatpush.msra.mxu3 %v1852_v54  ;;  %651 = vmatpush.msrb.mxu1 %v1733_v13 }
  0x72   :  { %637 = vmatpush.msrb.mxu0 %v1773_v29 }
  0x73   :  { %551 = vmatpush.msra.mxu3 %v1858_v55  ;;  %652 = vmatpush.msrb.mxu1 %v1739_v16 }
  0x74   :  { %638 = vmatpush.msrb.mxu0 %v1782_v33 }
  0x75   :  { %552 = vmatpush.msra.mxu3 %v1864_v56  ;;  %653 = vmatpush.msrb.mxu1 %v1747_v20 }
  0x76   :  { %639 = vmatpush.msrb.mxu0 %v1791_v36 }
  0x77   :  { %553 = vmatpush.msra.mxu3 %v1870_v57  ;;  %654 = vmatpush.msrb.mxu1 %v1757_v23 }
  0x78   :  { %640 = vmatpush.msrb.mxu0 %v1802_v39 }
  0x79   :  { %554 = vmatpush.msra.mxu3 %v1876_v58  ;;  %655 = vmatpush.msrb.mxu1 %v1768_v26 }
  0x7a   :  { %641 = vmatpush.msrb.mxu0 %v1813_v44 }
  0x7b   :  { %656 = vmatpush.msrb.mxu1 %v1777_v31 }
  0x7c   :  { %642 = vmatpush.msrb.mxu0 %v1823_v47 }
  0x7d   :  { %657 = vmatpush.msrb.mxu1 %v1786_v34 }
  0x7f   :  { %658 = vmatpush.msrb.mxu1 %v1795_v37 }
  0x81   :  { %659 = vmatpush.msrb.mxu1 %v1804_v40 }
  0x83   :  { %660 = vmatpush.msrb.mxu1 %v1817_v45 }
  0x85   :  { %661 = vmatpush.msrb.mxu1 %v1829_v49 }
  0x87   :  { %662 = vmatpush.msrb.mxu1 %v1837_v51 }
  0x9c   :  { %v203_v59 = vpop.f32.mrf.mxu0 }
  0x9d   :  { %v2008_v30 = vadd.f32 %v203_v59, %v173_v61 }
  0x9f   :  { %2436 = vst [vmem:[#allocation32_spill] sm:$0xff] %v2008_v30 }
  0xa0   :  { %v226_v0 = vpop.f32.mrf.mxu1 }
  0xa1   :  { %v2005_v17 = vadd.f32 %v226_v0, %v174_v2 }
  0xa3   :  { %2435 = vst [vmem:[#allocation31_spill] sm:$0xff] %v2005_v17 }
  0xa4   :  { %v206_v62 = vpop.f32.mrf.mxu0 }
  0xa5   :  { %v2000_v63 = vadd.f32 %v206_v62, %v173_v61  ;;  %v2014_v61 = vld [vmem:[%s2392_s6] ss:$0 sm:$0xff] }
  0xa6   :  { %2437 = vst [vmem:[#allocation33_spill] sm:$0xff] %v2014_v61 }
  0xa7   :  { %2433 = vst [vmem:[#allocation29_spill] sm:$0xff] %v2000_v63 }
  0xa8   :  { %v229_v10 = vpop.f32.mrf.mxu1 }
  0xa9   :  { %v2003_v15 = vadd.f32 %v229_v10, %v174_v2 }
  0xab   :  { %2434 = vst [vmem:[#allocation30_spill] sm:$0xff] %v2003_v15 }
  0xba   :  { %v294_v19 = vpop.f32.mrf.mxu0 }
  0xbb   :  { %v318_v28 = vadd.f32 %v294_v19, %v2005_v17 }
  0xbd   :  { %v1289_v41 = vmul.f32 -1.442695, %v318_v28  ;;  %v274_v42 = vpop.f32.mrf.mxu3 }
  0xbe   :  { %v317_v51 = vadd.f32 %v274_v42, %v2008_v30  ;;  %v2421_v42 = vperm.slane %v1997_v60, 2 }
  0xbf   :  { %1318 = vpow2.f32 %v1289_v41 }
  0xc0   :  { %v1288_v62 = vmul.f32 -1.442695, %v317_v51 }
  0xc2   :  { %1320 = vpow2.f32 %v1288_v62  ;;  %v314_v28 = vpop.f32.mrf.mxu1  ;;  %v249_v62 = vpop.f32.mrf.mxu2 }
  0xc3   :  { %v360_v30 = vadd.f32 %v2014_v61, %v314_v28 }
  0xc5   :  { %v1319_v63 = vpop.eup %1318 }
  0xc6   :  { %v326_v47 = vadd.f32 1.0, %v1319_v63 }
  0xc8   :  { %v1321_v58 = vpop.eup %1320  ;;  %1322 = vrcp.f32 %v326_v47  ;;  %vm347_vm3 = vweird.f32 %v326_v47  ;;  %v351_v39 = vand.u32 2147483647, %v326_v47 }
  0xc9   :  { %v325_v10 = vadd.f32 1.0, %v1321_v58 }
  0xca   :  { %vm352_vm8 = vcmp.eq.f32.partialorder %v351_v39, 8.507059e+37  ;;  %v2438_v39 = vld [vmem:[#allocation25_spill] sm:$0xff] }
  0xcb   :  { %1324 = vrcp.f32 %v325_v10  ;;  %v338_v51 = vand.u32 2147483648, %v325_v10  ;;  %v336_v63 = vand.u32 2147483647, %v325_v10  ;;  %vm332_vm2 = vweird.f32 %v325_v10 }
  0xcd   :  { %vm337_vm6 = vcmp.eq.f32.partialorder %v336_v63, 8.507059e+37  ;;  %v156_v63 = vld [vmem:[#allocation7 + $0x2] sm:$0x3] }
  0xce   :  { %v1323_v0 = vpop.eup %1322 }
  0xcf   :  { %v343_v2 = vmul.f32 %v1323_v0, %v326_v47  ;;  %vm348_vm4 = vweird.f32 %v1323_v0 }
  0xd0   :  { %vm349_vm7 = vmor %vm347_vm3, %vm348_vm4 }
  0xd1   :  { %v1325_v15 = vpop.eup %1324  ;;  %v344_v19 = vsub.f32 1.0, %v343_v2  ;;  %v353_v2 = vand.u32 2147483648, %v326_v47  ;;  %v2440_v47 = vld [vmem:[#allocation21_spill] sm:$0xff] }
  0xd2   :  { %v328_v49 = vmul.f32 %v1325_v15, %v325_v10  ;;  %vm333_vm1 = vweird.f32 %v1325_v15 }
  0xd3   :  { %v345_v58 = vmul.f32 %v1323_v0, %v344_v19  ;;  %vm334_vm5 = vmor %vm332_vm2, %vm333_vm1 }
  0xd4   :  { %v329_v59 = vsub.f32 1.0, %v328_v49  ;;  %v339_v49 = vor.u32 1.1754944e-38, %v338_v51 }
  0xd5   :  { %v346_v45 = vadd.f32 %v1323_v0, %v345_v58  ;;  %v2077_v58 = vpop.f32.mrf.mxu2 }
  0xd6   :  { %v330_v41 = vmul.f32 %v1325_v15, %v329_v59  ;;  %v2020_v59 = vadd.f32 %v249_v62, %v2421_v42  ;;  %2447 = vst [vmem:[#allocation25_spill] sm:$0xff] %v2077_v58 }
  0xd7   :  { %v350_v28 = vsel %vm349_vm7, %v1323_v0, %v346_v45  ;;  %v2439_v45 = vld [vmem:[#allocation19_spill] sm:$0xff]  ;;  %v2445_v0 = vld [vmem:[#allocation22_spill] sm:$0xff] }
  0xd8   :  { %v331_v17 = vadd.f32 %v1325_v15, %v330_v41  ;;  %v354_v41 = vor.u32 1.1754944e-38, %v353_v2 }
  0xda   :  { %v335_v44 = vsel %vm334_vm5, %v1325_v15, %v331_v17  ;;  %v355_v61 = vsel %vm352_vm8, %v354_v41, %v350_v28 }
  0xdb   :  { %v340_v57 = vsel %vm337_vm6, %v339_v49, %v335_v44  ;;  %v364_v51 = vsub.f32 1.0, %v355_v61  ;;  %v366_v17 = vmul.f32 %v355_v61, %v1825_v48  ;;  %v2441_v48 = vld [vmem:[#allocation26_spill] sm:$0xff]  ;;  %v2446_v61 = vld [vmem:[#allocation24_spill] sm:$0xff] }
  0xdc   :  { %v361_v19 = vmul.f32 %v360_v30, %v340_v57  ;;  %v2443_v57 = vld [vmem:[#allocation23_spill] sm:$0xff] }
  0xdd   :  { %v2444_v30 = vld [vmem:[#allocation27_spill] sm:$0xff] }
  0xde   :  { %v362_v10 = vadd.f32 %v361_v19, %v2020_v59 }
  0xe0   :  { %1326 = vtanh.f32 %v362_v10  ;;  %v2448_v10 = vld [vmem:[#allocation32_spill] sm:$0xff] }
  0xe6   :  { %v1327_v56 = vpop.eup %1326 }
  0xe7   :  { %v365_v15 = vmul.f32 %v1327_v56, %v364_v51  ;;  %v2442_v56 = vld [vmem:[#allocation20_spill] sm:$0xff]  ;;  %v2449_v51 = vld [vmem:[#allocation31_spill] sm:$0xff] }
  0xe9   :  { %v367_v62 = vadd.f32 %v366_v17, %v365_v15 }
  0xeb   :  { %368 = vst [vmem:[#allocation11] sm:$0x3] %v367_v62  ;;  %v2024_v44 = vmul.f32 %v367_v62, %v156_v63 }
  0xed   :  { %386 = vmatmul.f32.vlgmr.msrb.gmra.mxu2 %v2024_v44  ;;  %406 = vmatmul.f32.vlgmr.msrb.gmra.mxu3 %v2024_v44 }
  0xee   :  { %426 = vmatmul.f32.vlgmr.msra.gmra.mxu0 %v2024_v44  ;;  %667 = vmatpush.msrb.mxu2 %v1749_v21 }
  0xef   :  { %755 = vmatpush.msrb.mxu3 %v1701_v1  ;;  %775 = vmatpush.msra.mxu0 %v1706_v4 }
  0xf0   :  { %668 = vmatpush.msrb.mxu2 %v1761_v24 }
  0xf1   :  { %756 = vmatpush.msrb.mxu3 %v1704_v3  ;;  %776 = vmatpush.msra.mxu0 %v1711_v6 }
  0xf2   :  { %669 = vmatpush.msrb.mxu2 %v1770_v27 }
  0xf3   :  { %757 = vmatpush.msrb.mxu3 %v1708_v5  ;;  %777 = vmatpush.msra.mxu0 %v1717_v8 }
  0xf4   :  { %670 = vmatpush.msrb.mxu2 %v1779_v32 }
  0xf5   :  { %758 = vmatpush.msrb.mxu3 %v1714_v7  ;;  %778 = vmatpush.msra.mxu0 %v1725_v11 }
  0xf6   :  { %671 = vmatpush.msrb.mxu2 %v1788_v35 }
  0xf7   :  { %759 = vmatpush.msrb.mxu3 %v1720_v9  ;;  %779 = vmatpush.msra.mxu0 %v1733_v13 }
  0xf8   :  { %672 = vmatpush.msrb.mxu2 %v1797_v38 }
  0xf9   :  { %760 = vmatpush.msrb.mxu3 %v1730_v12  ;;  %780 = vmatpush.msra.mxu0 %v1739_v16 }
  0xfa   :  { %673 = vmatpush.msrb.mxu2 %v1808_v43 }
  0xfb   :  { %761 = vmatpush.msrb.mxu3 %v1736_v14  ;;  %781 = vmatpush.msra.mxu0 %v1747_v20 }
  0xfc   :  { %674 = vmatpush.msrb.mxu2 %v1819_v46 }
  0xfd   :  { %762 = vmatpush.msrb.mxu3 %v1742_v18  ;;  %782 = vmatpush.msra.mxu0 %v1757_v23 }
  0xfe   :  { %675 = vmatpush.msrb.mxu2 %v1834_v50 }
  0xff   :  { %763 = vmatpush.msrb.mxu3 %v1752_v22  ;;  %783 = vmatpush.msra.mxu0 %v1768_v26 }
 0x100   :  { %676 = vmatpush.msrb.mxu2 %v1842_v52 }
 0x101   :  { %764 = vmatpush.msrb.mxu3 %v1764_v25  ;;  %784 = vmatpush.msra.mxu0 %v1777_v31 }
 0x102   :  { %677 = vmatpush.msrb.mxu2 %v1847_v53 }
 0x103   :  { %765 = vmatpush.msrb.mxu3 %v1773_v29  ;;  %785 = vmatpush.msra.mxu0 %v1786_v34 }
 0x104   :  { %678 = vmatpush.msrb.mxu2 %v1852_v54 }
 0x105   :  { %766 = vmatpush.msrb.mxu3 %v1782_v33  ;;  %786 = vmatpush.msra.mxu0 %v1795_v37 }
 0x106   :  { %679 = vmatpush.msrb.mxu2 %v1858_v55 }
 0x107   :  { %767 = vmatpush.msrb.mxu3 %v1791_v36  ;;  %787 = vmatpush.msra.mxu0 %v1804_v40 }
 0x108   :  { %680 = vmatpush.msrb.mxu2 %v2438_v39 }
 0x109   :  { %768 = vmatpush.msrb.mxu3 %v2439_v45  ;;  %788 = vmatpush.msra.mxu0 %v2440_v47 }
 0x10a   :  { %681 = vmatpush.msrb.mxu2 %v2441_v48 }
 0x10b   :  { %769 = vmatpush.msrb.mxu3 %v2442_v56  ;;  %789 = vmatpush.msra.mxu0 %v2443_v57 }
 0x10c   :  { %682 = vmatpush.msrb.mxu2 %v2444_v30 }
 0x10d   :  { %770 = vmatpush.msrb.mxu3 %v2445_v0  ;;  %790 = vmatpush.msra.mxu0 %v2446_v61 }
 0x16b   :  { %v427_v57 = vpop.f32.mrf.mxu0 }
 0x170   :  { %v387_v49 = vpop.f32.mrf.mxu2  ;;  %v407_v2 = vpop.f32.mrf.mxu3 }
 0x171   :  { %v432_v19 = vrot.slane %v387_v49, 6  ;;  %v433_v41 = vrot.slane %v407_v2, 6 }
 0x173   :  { %v436_v28 = vadd.f32 %v432_v19, %v2448_v10  ;;  %v437_v15 = vadd.f32 %v433_v41, %v2449_v51  ;;  %v2450_v10 = vld [vmem:[#allocation33_spill] sm:$0xff] }
 0x174   :  { %v476_v41 = vadd.f32 %v2450_v10, %v427_v57 }
 0x175   :  { %v1290_v17 = vmul.f32 -1.442695, %v436_v28  ;;  %v1291_v63 = vmul.f32 -1.442695, %v437_v15 }
 0x177   :  { %1328 = vpow2.f32 %v1290_v17 }
 0x178   :  { %1330 = vpow2.f32 %v1291_v63 }
 0x17d   :  { %v1329_v62 = vpop.eup %1328 }
 0x17e   :  { %v1331_v42 = vpop.eup %1330  ;;  %v444_v60 = vadd.f32 1.0, %v1329_v62  ;;  %v478_v62 = vrot.slane %v476_v41, 6 }
 0x17f   :  { %v445_v0 = vadd.f32 1.0, %v1331_v42 }
 0x180   :  { %1332 = vrcp.f32 %v444_v60  ;;  %v457_v56 = vand.u32 2147483648, %v444_v60  ;;  %v455_v15 = vand.u32 2147483647, %v444_v60  ;;  %vm451_vm10 = vweird.f32 %v444_v60 }
 0x181   :  { %1334 = vrcp.f32 %v445_v0  ;;  %vm466_vm14 = vweird.f32 %v445_v0 }
 0x182   :  { %v458_v42 = vor.u32 1.1754944e-38, %v457_v56  ;;  %vm456_vm12 = vcmp.eq.f32.partialorder %v455_v15, 8.507059e+37 }
 0x186   :  { %v1333_v61 = vpop.eup %1332 }
 0x187   :  { %v1335_v58 = vpop.eup %1334  ;;  %v447_v30 = vmul.f32 %v1333_v61, %v444_v60  ;;  %vm452_vm9 = vweird.f32 %v1333_v61 }
 0x188   :  { %v462_v49 = vmul.f32 %v1335_v58, %v445_v0  ;;  %vm453_vm11 = vmor %vm451_vm10, %vm452_vm9  ;;  %vm467_vm13 = vweird.f32 %v1335_v58 }
 0x189   :  { %v448_v2 = vsub.f32 1.0, %v447_v30  ;;  %v472_v30 = vand.u32 2147483648, %v445_v0  ;;  %vm468_vm15 = vmor %vm466_vm14, %vm467_vm13 }
 0x18a   :  { %v463_v19 = vsub.f32 1.0, %v462_v49  ;;  %v470_v49 = vand.u32 2147483647, %v445_v0 }
 0x18b   :  { %v449_v28 = vmul.f32 %v1333_v61, %v448_v2  ;;  %v473_v10 = vor.u32 1.1754944e-38, %v472_v30 }
 0x18c   :  { %v464_v17 = vmul.f32 %v1335_v58, %v463_v19  ;;  %vm471_vm0 = vcmp.eq.f32.partialorder %v470_v49, 8.507059e+37  ;;  %v157_v19 = vld [vmem:[#allocation7 + $0x4] sm:$0x3] }
 0x18d   :  { %v450_v63 = vadd.f32 %v1333_v61, %v449_v28  ;;  %v493_v15 = vrot.slane %v157_v19, 6 }
 0x18e   :  { %v465_v47 = vadd.f32 %v1335_v58, %v464_v17 }
 0x18f   :  { %v454_v51 = vsel %vm453_vm11, %v1333_v61, %v450_v63  ;;  %v486_v61 = vrot.slane %v2024_v44, 6  ;;  %v2461_v63 = vld [vmem:[#allocation33_spill] sm:$0xff] }
 0x190   :  { %v459_v48 = vsel %vm456_vm12, %v458_v42, %v454_v51  ;;  %v469_v2 = vsel %vm468_vm15, %v1335_v58, %v465_v47 }
 0x191   :  { %v480_v45 = vmul.f32 %v478_v62, %v459_v48  ;;  %v474_v60 = vsel %vm471_vm0, %v473_v10, %v469_v2 }
 0x192   :  { %v483_v56 = vsub.f32 1.0, %v474_v60  ;;  %v488_v28 = vmul.f32 %v486_v61, %v474_v60 }
 0x193   :  { %v481_v57 = vadd.f32 %v480_v45, %v2020_v59 }
 0x195   :  { %1336 = vtanh.f32 %v481_v57 }
 0x19b   :  { %v1337_v41 = vpop.eup %1336 }
 0x19c   :  { %v484_v51 = vmul.f32 %v1337_v41, %v483_v56 }
 0x19e   :  { %v489_v48 = vadd.f32 %v488_v28, %v484_v51 }
 0x1a0   :  { %491 = vst [vmem:[#allocation11] sm:$0xc] %v489_v48  ;;  %v2084_v17 = vmul.f32 %v493_v15, %v489_v48 }
 0x1a2   :  { %v497_v0 = vrot.slane %v2084_v17, 2 }
 0x1a4   :  { %515 = vmatmul.f32.vlgmr.msra.gmra.mxu1 %v497_v0  ;;  %535 = vmatmul.f32.vlgmr.msra.gmra.mxu2 %v497_v0 }
 0x1a5   :  { %555 = vmatmul.f32.vlgmr.msra.gmra.mxu3 %v497_v0  ;;  %795 = vmatpush.msra.mxu1 %v1749_v21 }
 0x1a6   :  { %866 = vmatpush.msra.mxu2 %v1701_v1  ;;  %886 = vmatpush.msra.mxu3 %v1706_v4  ;;  %v2451_v1 = vld [vmem:[#allocation19_spill] sm:$0xff]  ;;  %v2453_v4 = vld [vmem:[#allocation26_spill] sm:$0xff] }
 0x1a7   :  { %796 = vmatpush.msra.mxu1 %v1761_v24 }
 0x1a8   :  { %867 = vmatpush.msra.mxu2 %v1704_v3  ;;  %887 = vmatpush.msra.mxu3 %v1711_v6  ;;  %v2452_v3 = vld [vmem:[#allocation21_spill] sm:$0xff]  ;;  %v2455_v6 = vld [vmem:[#allocation23_spill] sm:$0xff] }
 0x1a9   :  { %797 = vmatpush.msra.mxu1 %v1770_v27 }
 0x1aa   :  { %868 = vmatpush.msra.mxu2 %v1708_v5  ;;  %888 = vmatpush.msra.mxu3 %v1717_v8  ;;  %v2454_v5 = vld [vmem:[#allocation20_spill] sm:$0xff]  ;;  %v2457_v8 = vld [vmem:[#allocation22_spill] sm:$0xff] }
 0x1ab   :  { %798 = vmatpush.msra.mxu1 %v1779_v32 }
 0x1ac   :  { %869 = vmatpush.msra.mxu2 %v1714_v7  ;;  %889 = vmatpush.msra.mxu3 %v1725_v11  ;;  %v2456_v7 = vld [vmem:[#allocation27_spill] sm:$0xff] }
 0x1ad   :  { %799 = vmatpush.msra.mxu1 %v1788_v35 }
 0x1ae   :  { %870 = vmatpush.msra.mxu2 %v1720_v9  ;;  %890 = vmatpush.msra.mxu3 %v1733_v13  ;;  %v2458_v9 = vld [vmem:[#allocation24_spill] sm:$0xff] }
 0x1af   :  { %800 = vmatpush.msra.mxu1 %v1797_v38  ;;  %v2459_v13 = vld [vmem:[#allocation32_spill] sm:$0xff] }
 0x1b0   :  { %871 = vmatpush.msra.mxu2 %v1730_v12  ;;  %891 = vmatpush.msra.mxu3 %v1739_v16 }
 0x1b1   :  { %801 = vmatpush.msra.mxu1 %v1808_v43 }
 0x1b2   :  { %872 = vmatpush.msra.mxu2 %v1736_v14  ;;  %892 = vmatpush.msra.mxu3 %v1747_v20 }
 0x1b3   :  { %802 = vmatpush.msra.mxu1 %v1819_v46 }
 0x1b4   :  { %873 = vmatpush.msra.mxu2 %v1742_v18  ;;  %893 = vmatpush.msra.mxu3 %v1757_v23 }
 0x1b5   :  { %803 = vmatpush.msra.mxu1 %v1834_v50 }
 0x1b6   :  { %874 = vmatpush.msra.mxu2 %v1752_v22  ;;  %894 = vmatpush.msra.mxu3 %v1768_v26  ;;  %v2460_v22 = vld [vmem:[#allocation31_spill] sm:$0xff] }
 0x1b7   :  { %804 = vmatpush.msra.mxu1 %v1842_v52 }
 0x1b8   :  { %875 = vmatpush.msra.mxu2 %v1764_v25  ;;  %895 = vmatpush.msra.mxu3 %v1777_v31 }
 0x1b9   :  { %805 = vmatpush.msra.mxu1 %v1847_v53 }
 0x1ba   :  { %876 = vmatpush.msra.mxu2 %v1773_v29  ;;  %896 = vmatpush.msra.mxu3 %v1786_v34 }
 0x1bb   :  { %806 = vmatpush.msra.mxu1 %v1852_v54 }
 0x1bc   :  { %877 = vmatpush.msra.mxu2 %v1782_v33  ;;  %897 = vmatpush.msra.mxu3 %v1795_v37 }
 0x1bd   :  { %807 = vmatpush.msra.mxu1 %v1858_v55 }
 0x1be   :  { %878 = vmatpush.msra.mxu2 %v1791_v36  ;;  %898 = vmatpush.msra.mxu3 %v1804_v40 }
 0x1bf   :  { %808 = vmatpush.msra.mxu1 %v2438_v39 }
 0x1c0   :  { %879 = vmatpush.msra.mxu2 %v2451_v1  ;;  %899 = vmatpush.msra.mxu3 %v2452_v3 }
 0x1c1   :  { %809 = vmatpush.msra.mxu1 %v2453_v4 }
 0x1c2   :  { %880 = vmatpush.msra.mxu2 %v2454_v5  ;;  %900 = vmatpush.msra.mxu3 %v2455_v6 }
 0x1c3   :  { %810 = vmatpush.msra.mxu1 %v2456_v7 }
 0x1c4   :  { %881 = vmatpush.msra.mxu2 %v2457_v8  ;;  %901 = vmatpush.msra.mxu3 %v2458_v9 }
 0x221   :  { %v516_v11 = vpop.f32.mrf.mxu1 }
 0x222   :  { %v561_v12 = vrot.slane %v516_v11, 4 }
 0x224   :  { %v565_v14 = vadd.f32 %v561_v12, %v2459_v13  ;;  %v158_v12 = vld [vmem:[#allocation7 + $0x6] sm:$0x3] }
 0x226   :  { %v1292_v16 = vmul.f32 -1.442695, %v565_v14  ;;  %v614_v14 = vrot.slane %v2084_v17, 6  ;;  %v2147_v17 = vld [vmem:[#allocation10 + $0x170] sm:$0xff] }
 0x227   :  { %v536_v18 = vpop.f32.mrf.mxu2 }
 0x228   :  { %1338 = vpow2.f32 %v1292_v16  ;;  %v562_v20 = vrot.slane %v536_v18, 4  ;;  %v556_v44 = vpop.f32.mrf.mxu3 }
 0x229   :  { %v605_v42 = vadd.f32 %v2461_v63, %v556_v44  ;;  %v2161_v44 = vld [vmem:[#allocation10 + $0x140] sm:$0xff] }
 0x22a   :  { %v566_v23 = vadd.f32 %v562_v20, %v2460_v22 }
 0x22b   :  { %v607_v19 = vrot.slane %v605_v42, 4  ;;  %v2196_v42 = vld [vmem:[#allocation10 + $0xc8] sm:$0xff] }
 0x22c   :  { %v1293_v25 = vmul.f32 -1.442695, %v566_v23 }
 0x22e   :  { %v1339_v26 = vpop.eup %1338  ;;  %1340 = vpow2.f32 %v1293_v25  ;;  %v621_v25 = vrot.slane %v158_v12, 4 }
 0x22f   :  { %v573_v29 = vadd.f32 1.0, %v1339_v26 }
 0x231   :  { %1342 = vrcp.f32 %v573_v29  ;;  %v586_v47 = vand.u32 2147483648, %v573_v29  ;;  %v584_v10 = vand.u32 2147483647, %v573_v29  ;;  %vm580_vm2 = vweird.f32 %v573_v29 }
 0x233   :  { %v587_v57 = vor.u32 1.1754944e-38, %v586_v47  ;;  %vm585_vm4 = vcmp.eq.f32.partialorder %v584_v10, 8.507059e+37  ;;  %v2175_v47 = vld [vmem:[#allocation10 + $0x110] sm:$0xff]  ;;  %v2189_v10 = vld [vmem:[#allocation10 + $0xe0] sm:$0xff] }
 0x234   :  { %v1341_v31 = vpop.eup %1340 }
 0x235   :  { %v574_v33 = vadd.f32 1.0, %v1341_v31 }
 0x237   :  { %v1343_v34 = vpop.eup %1342  ;;  %1344 = vrcp.f32 %v574_v33  ;;  %v601_v41 = vand.u32 2147483648, %v574_v33  ;;  %v599_v28 = vand.u32 2147483647, %v574_v33  ;;  %vm595_vm6 = vweird.f32 %v574_v33 }
 0x238   :  { %v576_v36 = vmul.f32 %v1343_v34, %v573_v29  ;;  %vm581_vm1 = vweird.f32 %v1343_v34 }
 0x239   :  { %vm582_vm3 = vmor %vm580_vm2, %vm581_vm1  ;;  %v602_v0 = vor.u32 1.1754944e-38, %v601_v41  ;;  %vm600_vm8 = vcmp.eq.f32.partialorder %v599_v28, 8.507059e+37 }
 0x23a   :  { %v577_v45 = vsub.f32 1.0, %v576_v36  ;;  %v2154_v36 = vld [vmem:[#allocation10 + $0x158] sm:$0xff] }
 0x23c   :  { %v578_v58 = vmul.f32 %v1343_v34, %v577_v45  ;;  %v2168_v45 = vld [vmem:[#allocation10 + $0x128] sm:$0xff] }
 0x23d   :  { %v1345_v62 = vpop.eup %1344 }
 0x23e   :  { %v591_v30 = vmul.f32 %v1345_v62, %v574_v33  ;;  %v579_v49 = vadd.f32 %v1343_v34, %v578_v58  ;;  %vm596_vm5 = vweird.f32 %v1345_v62  ;;  %v2144_v33 = vld [vmem:[#allocation10 + $0x168] sm:$0xff]  ;;  %v2182_v58 = vld [vmem:[#allocation10 + $0xf8] sm:$0xff] }
 0x23f   :  { %vm597_vm7 = vmor %vm595_vm6, %vm596_vm5 }
 0x240   :  { %v592_v2 = vsub.f32 1.0, %v591_v30  ;;  %v583_v60 = vsel %vm582_vm3, %v1343_v34, %v579_v49  ;;  %v2151_v34 = vld [vmem:[#allocation10 + $0x150] sm:$0xff]  ;;  %v2210_v30 = vld [vmem:[#allocation10 + $0x98] sm:$0xff]  ;;  %v2217_v49 = vld [vmem:[#allocation10 + $0x80] sm:$0xff] }
 0x241   :  { %v588_v56 = vsel %vm585_vm4, %v587_v57, %v583_v60  ;;  %v2226_v57 = vld [vmem:[#allocation10 + $0x48] sm:$0xff] }
 0x242   :  { %v593_v61 = vmul.f32 %v1345_v62, %v592_v2  ;;  %v609_v51 = vmul.f32 %v607_v19, %v588_v56 }
 0x244   :  { %v594_v15 = vadd.f32 %v1345_v62, %v593_v61  ;;  %v610_v48 = vadd.f32 %v609_v51, %v2020_v59 }
 0x246   :  { %v598_v1 = vsel %vm597_vm7, %v1345_v62, %v594_v15  ;;  %1346 = vtanh.f32 %v610_v48  ;;  %v2203_v62 = vld [vmem:[#allocation10 + $0xb0] sm:$0xff] }
 0x247   :  { %v603_v11 = vsel %vm600_vm8, %v602_v0, %v598_v1 }
 0x248   :  { %v612_v16 = vsub.f32 1.0, %v603_v11  ;;  %v616_v23 = vmul.f32 %v614_v14, %v603_v11 }
 0x24c   :  { %v1347_v18 = vpop.eup %1346 }
 0x24d   :  { %v613_v20 = vmul.f32 %v1347_v18, %v612_v16 }
 0x24f   :  { %v617_v26 = vadd.f32 %v616_v23, %v613_v20 }
 0x251   :  { %619 = vst [vmem:[#allocation11] sm:$0x30] %v617_v26  ;;  %v2140_v29 = vmul.f32 %v621_v25, %v617_v26 }
 0x253   :  { %v625_v31 = vrot.slane %v2140_v29, 4 }
 0x255   :  { %643 = vmatmul.f32.vlgmr.msrb.gmra.mxu0 %v625_v31  ;;  %663 = vmatmul.f32.vlgmr.msrb.gmra.mxu1 %v625_v31 }
 0x256   :  { %683 = vmatmul.f32.vlgmr.msrb.gmra.mxu2 %v625_v31  ;;  %906 = vmatpush.msrb.mxu0 %v1749_v21  ;;  %v2158_v21 = vld [vmem:[#allocation10 + $0x138] sm:$0xff] }
 0x257   :  { %995 = vmatpush.msrb.mxu1 %v2144_v33  ;;  %1015 = vmatpush.msrb.mxu2 %v2147_v17 }
 0x258   :  { %907 = vmatpush.msrb.mxu0 %v1761_v24  ;;  %v2165_v24 = vld [vmem:[#allocation10 + $0x120] sm:$0xff] }
 0x259   :  { %996 = vmatpush.msrb.mxu1 %v2151_v34  ;;  %1016 = vmatpush.msrb.mxu2 %v2154_v36 }
 0x25a   :  { %908 = vmatpush.msrb.mxu0 %v1770_v27  ;;  %v2172_v27 = vld [vmem:[#allocation10 + $0x108] sm:$0xff] }
 0x25b   :  { %997 = vmatpush.msrb.mxu1 %v2158_v21  ;;  %1017 = vmatpush.msrb.mxu2 %v2161_v44 }
 0x25c   :  { %909 = vmatpush.msrb.mxu0 %v1779_v32  ;;  %v2179_v32 = vld [vmem:[#allocation10 + $0xf0] sm:$0xff] }
 0x25d   :  { %998 = vmatpush.msrb.mxu1 %v2165_v24  ;;  %1018 = vmatpush.msrb.mxu2 %v2168_v45 }
 0x25e   :  { %910 = vmatpush.msrb.mxu0 %v1788_v35  ;;  %v2186_v35 = vld [vmem:[#allocation10 + $0xd8] sm:$0xff] }
 0x25f   :  { %999 = vmatpush.msrb.mxu1 %v2172_v27  ;;  %1019 = vmatpush.msrb.mxu2 %v2175_v47 }
 0x260   :  { %911 = vmatpush.msrb.mxu0 %v1797_v38  ;;  %v2193_v38 = vld [vmem:[#allocation10 + $0xc0] sm:$0xff] }
 0x261   :  { %1000 = vmatpush.msrb.mxu1 %v2179_v32  ;;  %1020 = vmatpush.msrb.mxu2 %v2182_v58 }
 0x262   :  { %912 = vmatpush.msrb.mxu0 %v1808_v43  ;;  %v2200_v43 = vld [vmem:[#allocation10 + $0xa8] sm:$0xff] }
 0x263   :  { %1001 = vmatpush.msrb.mxu1 %v2186_v35  ;;  %1021 = vmatpush.msrb.mxu2 %v2189_v10 }
 0x264   :  { %913 = vmatpush.msrb.mxu0 %v1819_v46  ;;  %v2207_v46 = vld [vmem:[#allocation10 + $0x90] sm:$0xff] }
 0x265   :  { %1002 = vmatpush.msrb.mxu1 %v2193_v38  ;;  %1022 = vmatpush.msrb.mxu2 %v2196_v42 }
 0x266   :  { %914 = vmatpush.msrb.mxu0 %v1834_v50  ;;  %v2214_v50 = vld [vmem:[#allocation10 + $0x78] sm:$0xff] }
 0x267   :  { %1003 = vmatpush.msrb.mxu1 %v2200_v43  ;;  %1023 = vmatpush.msrb.mxu2 %v2203_v62 }
 0x268   :  { %915 = vmatpush.msrb.mxu0 %v1842_v52  ;;  %v2221_v52 = vld [vmem:[#allocation10 + $0x60] sm:$0xff] }
 0x269   :  { %1004 = vmatpush.msrb.mxu1 %v2207_v46  ;;  %1024 = vmatpush.msrb.mxu2 %v2210_v30 }
 0x26a   :  { %916 = vmatpush.msrb.mxu0 %v1847_v53  ;;  %v2231_v53 = vld [vmem:[#allocation10 + $0x30] sm:$0xff] }
 0x26b   :  { %1005 = vmatpush.msrb.mxu1 %v2214_v50  ;;  %1025 = vmatpush.msrb.mxu2 %v2217_v49 }
 0x26c   :  { %917 = vmatpush.msrb.mxu0 %v1852_v54 }
 0x26d   :  { %1006 = vmatpush.msrb.mxu1 %v2221_v52  ;;  %1026 = vmatpush.msrb.mxu2 %v1795_v37 }
 0x26e   :  { %918 = vmatpush.msrb.mxu0 %v1858_v55 }
 0x26f   :  { %1007 = vmatpush.msrb.mxu1 %v2226_v57  ;;  %1027 = vmatpush.msrb.mxu2 %v1804_v40 }
 0x270   :  { %919 = vmatpush.msrb.mxu0 %v2438_v39 }
 0x271   :  { %1008 = vmatpush.msrb.mxu1 %v2231_v53  ;;  %1028 = vmatpush.msrb.mxu2 %v2452_v3 }
 0x272   :  { %920 = vmatpush.msrb.mxu0 %v2453_v4 }
 0x273   :  { %1009 = vmatpush.msrb.mxu1 %v2454_v5  ;;  %1029 = vmatpush.msrb.mxu2 %v2455_v6 }
 0x274   :  { %921 = vmatpush.msrb.mxu0 %v2456_v7 }
 0x275   :  { %1010 = vmatpush.msrb.mxu1 %v2457_v8  ;;  %1030 = vmatpush.msrb.mxu2 %v2458_v9 }
 0x2d2   :  { %v644_v37 = vpop.f32.mrf.mxu0  ;;  %v664_v40 = vpop.f32.mrf.mxu1 }
 0x2d3   :  { %v689_v54 = vrot.slane %v644_v37, 2  ;;  %v690_v55 = vrot.slane %v664_v40, 2  ;;  %v159_v40 = vld [vmem:[#allocation7 + $0x8] sm:$0x3] }
 0x2d5   :  { %v693_v39 = vadd.f32 %v689_v54, %v2459_v13  ;;  %v694_v3 = vadd.f32 %v690_v55, %v2460_v22  ;;  %v742_v54 = vrot.slane %v2140_v29, 6  ;;  %v2256_v29 = vld [vmem:[#allocation10 + $0x160] sm:$0xff] }
 0x2d7   :  { %v1294_v2 = vmul.f32 -1.442695, %v693_v39  ;;  %v1295_v4 = vmul.f32 -1.442695, %v694_v3 }
 0x2d9   :  { %1348 = vpow2.f32 %v1294_v2  ;;  %v684_v61 = vpop.f32.mrf.mxu2 }
 0x2da   :  { %1350 = vpow2.f32 %v1295_v4  ;;  %v733_v15 = vadd.f32 %v2461_v63, %v684_v61  ;;  %v749_v4 = vrot.slane %v159_v40, 2 }
 0x2dc   :  { %v735_v12 = vrot.slane %v733_v15, 2 }
 0x2df   :  { %v1349_v5 = vpop.eup %1348 }
 0x2e0   :  { %v1351_v6 = vpop.eup %1350  ;;  %v701_v60 = vadd.f32 1.0, %v1349_v5 }
 0x2e1   :  { %v702_v7 = vadd.f32 1.0, %v1351_v6 }
 0x2e2   :  { %1352 = vrcp.f32 %v701_v60  ;;  %v714_v13 = vand.u32 2147483648, %v701_v60  ;;  %v712_v22 = vand.u32 2147483647, %v701_v60  ;;  %vm708_vm10 = vweird.f32 %v701_v60 }
 0x2e3   :  { %1354 = vrcp.f32 %v702_v7  ;;  %v729_v18 = vand.u32 2147483648, %v702_v7  ;;  %vm723_vm14 = vweird.f32 %v702_v7  ;;  %v727_v23 = vand.u32 2147483647, %v702_v7 }
 0x2e4   :  { %v715_v1 = vor.u32 1.1754944e-38, %v714_v13  ;;  %vm713_vm12 = vcmp.eq.f32.partialorder %v712_v22, 8.507059e+37 }
 0x2e5   :  { %v730_v31 = vor.u32 1.1754944e-38, %v729_v18  ;;  %vm728_vm0 = vcmp.eq.f32.partialorder %v727_v23, 8.507059e+37 }
 0x2e8   :  { %v1353_v8 = vpop.eup %1352 }
 0x2e9   :  { %v1355_v9 = vpop.eup %1354  ;;  %v704_v19 = vmul.f32 %v1353_v8, %v701_v60  ;;  %vm709_vm9 = vweird.f32 %v1353_v8 }
 0x2ea   :  { %v719_v56 = vmul.f32 %v1355_v9, %v702_v7  ;;  %vm710_vm11 = vmor %vm708_vm10, %vm709_vm9  ;;  %vm724_vm13 = vweird.f32 %v1355_v9  ;;  %v2261_v7 = vld [vmem:[#allocation10 + $0x148] sm:$0xff] }
 0x2eb   :  { %v705_v41 = vsub.f32 1.0, %v704_v19  ;;  %vm725_vm15 = vmor %vm723_vm14, %vm724_vm13 }
 0x2ec   :  { %v720_v51 = vsub.f32 1.0, %v719_v56 }
 0x2ed   :  { %v706_v28 = vmul.f32 %v1353_v8, %v705_v41 }
 0x2ee   :  { %v721_v48 = vmul.f32 %v1355_v9, %v720_v51 }
 0x2ef   :  { %v707_v0 = vadd.f32 %v1353_v8, %v706_v28 }
 0x2f0   :  { %v722_v16 = vadd.f32 %v1355_v9, %v721_v48 }
 0x2f1   :  { %v711_v11 = vsel %vm710_vm11, %v1353_v8, %v707_v0  ;;  %v2266_v8 = vld [vmem:[#allocation10 + $0x130] sm:$0xff] }
 0x2f2   :  { %v716_v14 = vsel %vm713_vm12, %v715_v1, %v711_v11  ;;  %v726_v26 = vsel %vm725_vm15, %v1355_v9, %v722_v16 }
 0x2f3   :  { %v737_v20 = vmul.f32 %v735_v12, %v716_v14  ;;  %v731_v37 = vsel %vm728_vm0, %v730_v31, %v726_v26 }
 0x2f4   :  { %v740_v55 = vsub.f32 1.0, %v731_v37  ;;  %v744_v2 = vmul.f32 %v742_v54, %v731_v37  ;;  %v2464_v37 = vld [vmem:[#allocation28_spill] sm:$0xff]  ;;  %v2466_v54 = vld [vmem:[#allocation25_spill] sm:$0xff] }
 0x2f5   :  { %v738_v25 = vadd.f32 %v737_v20, %v2020_v59  ;;  %v2251_v59 = vld [vmem:[#allocation10 + $0x178] sm:$0xff]  ;;  %v2465_v40 = vperm.slane %v2464_v37, 2 }
 0x2f7   :  { %1356 = vtanh.f32 %v738_v25 }
 0x2fd   :  { %v1357_v39 = vpop.eup %1356 }
 0x2fe   :  { %v741_v3 = vmul.f32 %v1357_v39, %v740_v55  ;;  %v2330_v55 = vadd.f32 %v2466_v54, %v2465_v40 }
 0x300   :  { %v745_v5 = vadd.f32 %v744_v2, %v741_v3 }
 0x302   :  { %747 = vst [vmem:[#allocation11] sm:$0xc0] %v745_v5  ;;  %v751_v6 = vmul.f32 %v749_v4, %v745_v5 }
 0x304   :  { %v2246_v60 = vrot.slane %v751_v6, 6 }
 0x306   :  { %771 = vmatmul.f32.vlgmr.msrb.gmra.mxu3 %v2246_v60  ;;  %791 = vmatmul.f32.vlgmr.msra.gmra.mxu0 %v2246_v60 }
 0x307   :  { %811 = vmatmul.f32.vlgmr.msra.gmra.mxu1 %v2246_v60  ;;  %1035 = vmatpush.msrb.mxu3 %v2251_v59 }
 0x308   :  { %1123 = vmatpush.msra.mxu0 %v2144_v33  ;;  %1143 = vmatpush.msra.mxu1 %v2147_v17  ;;  %v2271_v33 = vld [vmem:[#allocation10 + $0x118] sm:$0xff]  ;;  %v2276_v17 = vld [vmem:[#allocation10 + $0x100] sm:$0xff] }
 0x309   :  { %1036 = vmatpush.msrb.mxu3 %v2256_v29 }
 0x30a   :  { %1124 = vmatpush.msra.mxu0 %v2151_v34  ;;  %1144 = vmatpush.msra.mxu1 %v2154_v36  ;;  %v2281_v34 = vld [vmem:[#allocation10 + $0xe8] sm:$0xff]  ;;  %v2286_v36 = vld [vmem:[#allocation10 + $0xd0] sm:$0xff] }
 0x30b   :  { %1037 = vmatpush.msrb.mxu3 %v2261_v7 }
 0x30c   :  { %1125 = vmatpush.msra.mxu0 %v2158_v21  ;;  %1145 = vmatpush.msra.mxu1 %v2161_v44  ;;  %v2291_v21 = vld [vmem:[#allocation10 + $0xb8] sm:$0xff]  ;;  %v2296_v44 = vld [vmem:[#allocation10 + $0xa0] sm:$0xff] }
 0x30d   :  { %1038 = vmatpush.msrb.mxu3 %v2266_v8 }
 0x30e   :  { %1126 = vmatpush.msra.mxu0 %v2165_v24  ;;  %1146 = vmatpush.msra.mxu1 %v2168_v45  ;;  %v2301_v24 = vld [vmem:[#allocation10 + $0x88] sm:$0xff]  ;;  %v2306_v45 = vld [vmem:[#allocation10 + $0x70] sm:$0xff] }
 0x30f   :  { %1039 = vmatpush.msrb.mxu3 %v2271_v33 }
 0x310   :  { %1127 = vmatpush.msra.mxu0 %v2172_v27  ;;  %1147 = vmatpush.msra.mxu1 %v2175_v47  ;;  %v1435_v27 = vld [vmem:[#allocation10 + $0x68] sm:$0xff]  ;;  %v2310_v47 = vld [vmem:[#allocation10 + $0x58] sm:$0xff] }
 0x311   :  { %1040 = vmatpush.msrb.mxu3 %v2276_v17 }
 0x312   :  { %1128 = vmatpush.msra.mxu0 %v2179_v32  ;;  %1148 = vmatpush.msra.mxu1 %v2182_v58  ;;  %v1437_v32 = vld [vmem:[#allocation10 + $0x50] sm:$0xff]  ;;  %v2314_v58 = vld [vmem:[#allocation10 + $0x40] sm:$0xff] }
 0x313   :  { %1041 = vmatpush.msrb.mxu3 %v2281_v34 }
 0x314   :  { %1129 = vmatpush.msra.mxu0 %v2186_v35  ;;  %1149 = vmatpush.msra.mxu1 %v2189_v10  ;;  %v1439_v35 = vld [vmem:[#allocation10 + $0x38] sm:$0xff]  ;;  %v2318_v10 = vld [vmem:[#allocation10 + $0x28] sm:$0xff] }
 0x315   :  { %1042 = vmatpush.msrb.mxu3 %v2286_v36 }
 0x316   :  { %1130 = vmatpush.msra.mxu0 %v2193_v38  ;;  %1150 = vmatpush.msra.mxu1 %v2196_v42  ;;  %v1441_v38 = vld [vmem:[#allocation10 + $0x18] sm:$0xff]  ;;  %v1442_v42 = vld [vmem:[#allocation10 + $0x20] sm:$0xff] }
 0x317   :  { %1043 = vmatpush.msrb.mxu3 %v2291_v21 }
 0x318   :  { %1131 = vmatpush.msra.mxu0 %v2200_v43  ;;  %1151 = vmatpush.msra.mxu1 %v2203_v62  ;;  %v2321_v43 = vld [vmem:[#allocation10 + $0x10] sm:$0xff]  ;;  %v1444_v62 = vld [vmem:[#allocation10] sm:$0xff] }
 0x319   :  { %1044 = vmatpush.msrb.mxu3 %v2296_v44 }
 0x31a   :  { %1132 = vmatpush.msra.mxu0 %v2207_v46  ;;  %1152 = vmatpush.msra.mxu1 %v2210_v30  ;;  %v1445_v46 = vld [vmem:[#allocation10 + $0x8] sm:$0xff] }
 0x31b   :  { %1045 = vmatpush.msrb.mxu3 %v2301_v24 }
 0x31c   :  { %1133 = vmatpush.msra.mxu0 %v2214_v50  ;;  %1153 = vmatpush.msra.mxu1 %v2217_v49  ;;  %v2462_v50 = vld [vmem:[#allocation30_spill] sm:$0xff] }
 0x31d   :  { %1046 = vmatpush.msrb.mxu3 %v2306_v45 }
 0x31e   :  { %1134 = vmatpush.msra.mxu0 %v2221_v52  ;;  %1154 = vmatpush.msra.mxu1 %v1435_v27 }
 0x31f   :  { %1047 = vmatpush.msrb.mxu3 %v2310_v47 }
 0x320   :  { %1135 = vmatpush.msra.mxu0 %v2226_v57  ;;  %1155 = vmatpush.msra.mxu1 %v1437_v32 }
 0x321   :  { %1048 = vmatpush.msrb.mxu3 %v2314_v58 }
 0x322   :  { %1136 = vmatpush.msra.mxu0 %v2231_v53  ;;  %1156 = vmatpush.msra.mxu1 %v1439_v35  ;;  %v2463_v53 = vld [vmem:[#allocation29_spill] sm:$0xff] }
 0x323   :  { %1049 = vmatpush.msrb.mxu3 %v2318_v10 }
 0x324   :  { %1137 = vmatpush.msra.mxu0 %v1441_v38  ;;  %1157 = vmatpush.msra.mxu1 %v1442_v42  ;;  %v160_v42 = vld [vmem:[#allocation7 + $0xa] sm:$0x3] }
 0x325   :  { %1050 = vmatpush.msrb.mxu3 %v2321_v43 }
 0x326   :  { %1138 = vmatpush.msra.mxu0 %v1444_v62  ;;  %1158 = vmatpush.msra.mxu1 %v1445_v46 }
 0x383   :  { %v792_v30 = vpop.f32.mrf.mxu0 }
 0x384   :  { %v816_v49 = vadd.f32 %v792_v30, %v2462_v50  ;;  %v812_v16 = vpop.f32.mrf.mxu1 }
 0x385   :  { %v855_v23 = vadd.f32 %v2461_v63, %v812_v16 }
 0x386   :  { %v1297_v52 = vmul.f32 -1.442695, %v816_v49 }
 0x388   :  { %1358 = vpow2.f32 %v1297_v52 }
 0x389   :  { %v772_v57 = vpop.f32.mrf.mxu3 }
 0x38a   :  { %v815_v9 = vadd.f32 %v772_v57, %v2463_v53  ;;  %v2360_v57 = vld [vmem:[%s2392_s6] ss:$0 sm:$0xff]  ;;  %s1636_s6 = smov [#allocation11]  }
 0x38b   :  { %s1249_s14 = sshll.u32 %s1636_s6, 4  ;;  %s1250_s14 = int_to_ptr.vmem [resolvable:$true] %s1249_s14 }
 0x38c   :  { %v1296_v19 = vmul.f32 -1.442695, %v815_v9 }
 0x38e   :  { %v1359_v56 = vpop.eup %1358  ;;  %1360 = vpow2.f32 %v1296_v19 }
 0x38f   :  { %v824_v61 = vadd.f32 1.0, %v1359_v56 }
 0x391   :  { %1362 = vrcp.f32 %v824_v61  ;;  %v851_v39 = vand.u32 2147483648, %v824_v61  ;;  %vm845_vm6 = vweird.f32 %v824_v61  ;;  %v849_v2 = vand.u32 2147483647, %v824_v61 }
 0x393   :  { %v852_v6 = vor.u32 1.1754944e-38, %v851_v39  ;;  %vm850_vm8 = vcmp.eq.f32.partialorder %v849_v2, 8.507059e+37 }
 0x394   :  { %v1361_v41 = vpop.eup %1360 }
 0x395   :  { %v823_v51 = vadd.f32 1.0, %v1361_v41 }
 0x397   :  { %1364 = vrcp.f32 %v823_v51  ;;  %v1363_v13 = vpop.eup %1362  ;;  %v836_v1 = vand.u32 2147483648, %v823_v51  ;;  %v834_v12 = vand.u32 2147483647, %v823_v51  ;;  %vm830_vm2 = vweird.f32 %v823_v51 }
 0x398   :  { %v841_v28 = vmul.f32 %v1363_v13, %v824_v61  ;;  %vm846_vm5 = vweird.f32 %v1363_v13 }
 0x399   :  { %v837_v20 = vor.u32 1.1754944e-38, %v836_v1  ;;  %vm835_vm4 = vcmp.eq.f32.partialorder %v834_v12, 8.507059e+37  ;;  %vm847_vm7 = vmor %vm845_vm6, %vm846_vm5 }
 0x39a   :  { %v842_v48 = vsub.f32 1.0, %v841_v28 }
 0x39c   :  { %v843_v14 = vmul.f32 %v1363_v13, %v842_v48 }
 0x39d   :  { %v1365_v22 = vpop.eup %1364 }
 0x39e   :  { %v826_v15 = vmul.f32 %v1365_v22, %v823_v51  ;;  %vm831_vm1 = vweird.f32 %v1365_v22  ;;  %v844_v31 = vadd.f32 %v1363_v13, %v843_v14 }
 0x39f   :  { %vm832_vm3 = vmor %vm830_vm2, %vm831_vm1 }
 0x3a0   :  { %v827_v0 = vsub.f32 1.0, %v826_v15  ;;  %v848_v5 = vsel %vm847_vm7, %v1363_v13, %v844_v31 }
 0x3a1   :  { %v853_v63 = vsel %vm850_vm8, %v852_v6, %v848_v5 }
 0x3a2   :  { %v828_v11 = vmul.f32 %v1365_v22, %v827_v0  ;;  %v859_v27 = vsub.f32 1.0, %v853_v63  ;;  %v861_v38 = vmul.f32 %v853_v63, %v2246_v60 }
 0x3a4   :  { %v829_v18 = vadd.f32 %v1365_v22, %v828_v11 }
 0x3a6   :  { %v833_v25 = vsel %vm832_vm3, %v1365_v22, %v829_v18  ;;  %v161_v18 = vld [vmem:[#allocation7 + $0xc] sm:$0x3] }
 0x3a7   :  { %v838_v26 = vsel %vm835_vm4, %v837_v20, %v833_v25  ;;  %v989_v37 = vrot.slane %v161_v18, 6 }
 0x3a8   :  { %v856_v3 = vmul.f32 %v855_v23, %v838_v26 }
 0x3aa   :  { %v857_v4 = vadd.f32 %v856_v3, %v2330_v55 }
 0x3ac   :  { %1366 = vtanh.f32 %v857_v4 }
 0x3b2   :  { %v1367_v32 = vpop.eup %1366 }
 0x3b3   :  { %v860_v35 = vmul.f32 %v1367_v32, %v859_v27 }
 0x3b5   :  { %v862_v62 = vadd.f32 %v861_v38, %v860_v35 }
 0x3b7   :  { %864 = vst [vmem:[#allocation11 + $0x8] sm:$0x3] %v862_v62  ;;  %v2334_v46 = vmul.f32 %v862_v62, %v160_v42 }
 0x3b9   :  { %882 = vmatmul.f32.vlgmr.msra.gmra.mxu2 %v2334_v46  ;;  %902 = vmatmul.f32.vlgmr.msra.gmra.mxu3 %v2334_v46  ;;  %v982_v23 = vrot.slane %v2334_v46, 6 }
 0x3ba   :  { %922 = vmatmul.f32.vlgmr.msrb.gmra.mxu0 %v2334_v46  ;;  %1163 = vmatpush.msra.mxu2 %v2251_v59 }
 0x3bc   :  { %1164 = vmatpush.msra.mxu2 %v2256_v29 }
 0x3be   :  { %1165 = vmatpush.msra.mxu2 %v2261_v7 }
 0x3c0   :  { %1166 = vmatpush.msra.mxu2 %v2266_v8 }
 0x3c2   :  { %1167 = vmatpush.msra.mxu2 %v2271_v33 }
 0x3c4   :  { %1168 = vmatpush.msra.mxu2 %v2276_v17 }
 0x3c6   :  { %1169 = vmatpush.msra.mxu2 %v2281_v34 }
 0x3c8   :  { %1170 = vmatpush.msra.mxu2 %v2286_v36 }
 0x3ca   :  { %1171 = vmatpush.msra.mxu2 %v2291_v21 }
 0x3cc   :  { %1172 = vmatpush.msra.mxu2 %v2296_v44 }
 0x3ce   :  { %1173 = vmatpush.msra.mxu2 %v2301_v24 }
 0x3d0   :  { %1174 = vmatpush.msra.mxu2 %v2306_v45 }
 0x3d2   :  { %1175 = vmatpush.msra.mxu2 %v2310_v47 }
 0x3d4   :  { %1176 = vmatpush.msra.mxu2 %v2314_v58 }
 0x3d6   :  { %1177 = vmatpush.msra.mxu2 %v2318_v10 }
 0x3d8   :  { %1178 = vmatpush.msra.mxu2 %v2321_v43 }
 0x437   :  { %v923_v10 = vpop.f32.mrf.mxu0 }
 0x438   :  { %v972_v9 = vadd.f32 %v2360_v57, %v923_v10 }
 0x43a   :  { %v974_v13 = vrot.slane %v972_v9, 6 }
 0x43c   :  { %v883_v60 = vpop.f32.mrf.mxu2  ;;  %v903_v59 = vpop.f32.mrf.mxu3 }
 0x43d   :  { %v928_v29 = vrot.slane %v883_v60, 6  ;;  %v929_v7 = vrot.slane %v903_v59, 6 }
 0x43f   :  { %v932_v8 = vadd.f32 %v928_v29, %v2463_v53  ;;  %v933_v33 = vadd.f32 %v929_v7, %v2462_v50 }
 0x441   :  { %v1298_v17 = vmul.f32 -1.442695, %v932_v8  ;;  %v1299_v34 = vmul.f32 -1.442695, %v933_v33 }
 0x443   :  { %1368 = vpow2.f32 %v1298_v17 }
 0x444   :  { %1370 = vpow2.f32 %v1299_v34 }
 0x449   :  { %v1369_v36 = vpop.eup %1368 }
 0x44a   :  { %v1371_v21 = vpop.eup %1370  ;;  %v940_v44 = vadd.f32 1.0, %v1369_v36 }
 0x44b   :  { %v941_v24 = vadd.f32 1.0, %v1371_v21 }
 0x44c   :  { %1372 = vrcp.f32 %v940_v44  ;;  %v953_v49 = vand.u32 2147483648, %v940_v44  ;;  %v951_v56 = vand.u32 2147483647, %v940_v44  ;;  %vm947_vm10 = vweird.f32 %v940_v44 }
 0x44d   :  { %1374 = vrcp.f32 %v941_v24  ;;  %v968_v0 = vand.u32 2147483648, %v941_v24  ;;  %vm962_vm14 = vweird.f32 %v941_v24  ;;  %v966_v1 = vand.u32 2147483647, %v941_v24 }
 0x44e   :  { %v954_v51 = vor.u32 1.1754944e-38, %v953_v49  ;;  %vm952_vm12 = vcmp.eq.f32.partialorder %v951_v56, 8.507059e+37 }
 0x44f   :  { %v969_v14 = vor.u32 1.1754944e-38, %v968_v0  ;;  %vm967_vm0 = vcmp.eq.f32.partialorder %v966_v1, 8.507059e+37 }
 0x452   :  { %v1373_v45 = vpop.eup %1372 }
 0x453   :  { %v1375_v47 = vpop.eup %1374  ;;  %v943_v58 = vmul.f32 %v1373_v45, %v940_v44  ;;  %vm948_vm9 = vweird.f32 %v1373_v45 }
 0x454   :  { %v958_v43 = vmul.f32 %v1375_v47, %v941_v24  ;;  %vm949_vm11 = vmor %vm947_vm10, %vm948_vm9  ;;  %vm963_vm13 = vweird.f32 %v1375_v47 }
 0x455   :  { %v944_v30 = vsub.f32 1.0, %v943_v58  ;;  %vm964_vm15 = vmor %vm962_vm14, %vm963_vm13 }
 0x456   :  { %v959_v52 = vsub.f32 1.0, %v958_v43 }
 0x457   :  { %v945_v19 = vmul.f32 %v1373_v45, %v944_v30 }
 0x458   :  { %v960_v61 = vmul.f32 %v1375_v47, %v959_v52 }
 0x459   :  { %v946_v41 = vadd.f32 %v1373_v45, %v945_v19 }
 0x45a   :  { %v961_v15 = vadd.f32 %v1375_v47, %v960_v61 }
 0x45b   :  { %v950_v28 = vsel %vm949_vm11, %v1373_v45, %v946_v41  ;;  %v162_v41 = vld [vmem:[#allocation7 + $0xe] sm:$0x3] }
 0x45c   :  { %v955_v22 = vsel %vm952_vm12, %v954_v51, %v950_v28  ;;  %v965_v12 = vsel %vm964_vm15, %v1375_v47, %v961_v15 }
 0x45d   :  { %v976_v48 = vmul.f32 %v974_v13, %v955_v22  ;;  %v970_v16 = vsel %vm967_vm0, %v969_v14, %v965_v12 }
 0x45e   :  { %v979_v20 = vsub.f32 1.0, %v970_v16  ;;  %v984_v31 = vmul.f32 %v982_v23, %v970_v16 }
 0x45f   :  { %v977_v11 = vadd.f32 %v976_v48, %v2330_v55  ;;  %v1117_v48 = vrot.slane %v162_v41, 4 }
 0x461   :  { %1376 = vtanh.f32 %v977_v11 }
 0x467   :  { %v1377_v25 = vpop.eup %1376 }
 0x468   :  { %v980_v26 = vmul.f32 %v1377_v25, %v979_v20 }
 0x46a   :  { %v985_v40 = vadd.f32 %v984_v31, %v980_v26 }
 0x46c   :  { %987 = vst [vmem:[#allocation11 + $0x8] sm:$0xc] %v985_v40  ;;  %v991_v54 = vmul.f32 %v989_v37, %v985_v40 }
 0x46e   :  { %v993_v39 = vrot.slane %v991_v54, 2  ;;  %v1110_v51 = vrot.slane %v991_v54, 6 }
 0x470   :  { %1011 = vmatmul.f32.vlgmr.msrb.gmra.mxu1 %v993_v39  ;;  %1031 = vmatmul.f32.vlgmr.msrb.gmra.mxu2 %v993_v39 }
 0x471   :  { %1051 = vmatmul.f32.vlgmr.msrb.gmra.mxu3 %v993_v39 }
 0x4ed   :  { %v1012_v3 = vpop.f32.mrf.mxu1 }
 0x4ee   :  { %v1057_v2 = vrot.slane %v1012_v3, 4 }
 0x4f0   :  { %v1061_v4 = vadd.f32 %v1057_v2, %v2463_v53 }
 0x4f2   :  { %v1300_v5 = vmul.f32 -1.442695, %v1061_v4 }
 0x4f3   :  { %v1032_v6 = vpop.f32.mrf.mxu2 }
 0x4f4   :  { %1378 = vpow2.f32 %v1300_v5  ;;  %v1058_v63 = vrot.slane %v1032_v6, 4  ;;  %v1052_v59 = vpop.f32.mrf.mxu3 }
 0x4f5   :  { %v1101_v17 = vadd.f32 %v2360_v57, %v1052_v59 }
 0x4f6   :  { %v1062_v27 = vadd.f32 %v1058_v63, %v2462_v50 }
 0x4f7   :  { %v1103_v47 = vrot.slane %v1101_v17, 4 }
 0x4f8   :  { %v1301_v32 = vmul.f32 -1.442695, %v1062_v27 }
 0x4fa   :  { %v1379_v35 = vpop.eup %1378  ;;  %1380 = vpow2.f32 %v1301_v32 }
 0x4fb   :  { %v1069_v38 = vadd.f32 1.0, %v1379_v35 }
 0x4fd   :  { %1382 = vrcp.f32 %v1069_v38  ;;  %v1082_v7 = vand.u32 2147483648, %v1069_v38  ;;  %v1080_v33 = vand.u32 2147483647, %v1069_v38  ;;  %vm1076_vm2 = vweird.f32 %v1069_v38 }
 0x4ff   :  { %v1083_v44 = vor.u32 1.1754944e-38, %v1082_v7  ;;  %vm1081_vm4 = vcmp.eq.f32.partialorder %v1080_v33, 8.507059e+37 }
 0x500   :  { %v1381_v42 = vpop.eup %1380 }
 0x501   :  { %v1070_v62 = vadd.f32 1.0, %v1381_v42 }
 0x503   :  { %v1383_v46 = vpop.eup %1382  ;;  %1384 = vrcp.f32 %v1070_v62  ;;  %v1097_v43 = vand.u32 2147483648, %v1070_v62  ;;  %v1095_v49 = vand.u32 2147483647, %v1070_v62  ;;  %vm1091_vm6 = vweird.f32 %v1070_v62 }
 0x504   :  { %v1072_v60 = vmul.f32 %v1383_v46, %v1069_v38  ;;  %vm1077_vm1 = vweird.f32 %v1383_v46 }
 0x505   :  { %vm1078_vm3 = vmor %vm1076_vm2, %vm1077_vm1  ;;  %v1098_v19 = vor.u32 1.1754944e-38, %v1097_v43  ;;  %vm1096_vm8 = vcmp.eq.f32.partialorder %v1095_v49, 8.507059e+37 }
 0x506   :  { %v1073_v29 = vsub.f32 1.0, %v1072_v60 }
 0x508   :  { %v1074_v8 = vmul.f32 %v1383_v46, %v1073_v29 }
 0x509   :  { %v1385_v34 = vpop.eup %1384 }
 0x50a   :  { %v1087_v36 = vmul.f32 %v1385_v34, %v1070_v62  ;;  %v1075_v21 = vadd.f32 %v1383_v46, %v1074_v8  ;;  %vm1092_vm5 = vweird.f32 %v1385_v34 }
 0x50b   :  { %vm1093_vm7 = vmor %vm1091_vm6, %vm1092_vm5 }
 0x50c   :  { %v1088_v24 = vsub.f32 1.0, %v1087_v36  ;;  %v1079_v45 = vsel %vm1078_vm3, %v1383_v46, %v1075_v21 }
 0x50d   :  { %v1084_v58 = vsel %vm1081_vm4, %v1083_v44, %v1079_v45 }
 0x50e   :  { %v1089_v10 = vmul.f32 %v1385_v34, %v1088_v24  ;;  %v1105_v30 = vmul.f32 %v1103_v47, %v1084_v58 }
 0x510   :  { %v1090_v52 = vadd.f32 %v1385_v34, %v1089_v10  ;;  %v1106_v9 = vadd.f32 %v1105_v30, %v2330_v55 }
 0x512   :  { %v1094_v56 = vsel %vm1093_vm7, %v1385_v34, %v1090_v52  ;;  %1386 = vtanh.f32 %v1106_v9 }
 0x513   :  { %v1099_v61 = vsel %vm1096_vm8, %v1098_v19, %v1094_v56 }
 0x514   :  { %v1108_v13 = vsub.f32 1.0, %v1099_v61  ;;  %v1112_v15 = vmul.f32 %v1110_v51, %v1099_v61 }
 0x518   :  { %v1387_v28 = vpop.eup %1386 }
 0x519   :  { %v1109_v22 = vmul.f32 %v1387_v28, %v1108_v13 }
 0x51b   :  { %v1113_v0 = vadd.f32 %v1112_v15, %v1109_v22 }
 0x51d   :  { %1115 = vst [vmem:[#allocation11 + $0x8] sm:$0x30] %v1113_v0  ;;  %v2369_v1 = vmul.f32 %v1117_v48, %v1113_v0 }
 0x51f   :  { %v1121_v11 = vrot.slane %v2369_v1, 4  ;;  %v1238_v36 = vrot.slane %v2369_v1, 6 }
 0x521   :  { %1139 = vmatmul.f32.vlgmr.msra.gmra.mxu0 %v1121_v11  ;;  %1159 = vmatmul.f32.vlgmr.msra.gmra.mxu1 %v1121_v11 }
 0x522   :  { %1179 = vmatmul.f32.vlgmr.msra.gmra.mxu2 %v1121_v11 }
 0x59e   :  { %v1140_v12 = vpop.f32.mrf.mxu0  ;;  %v1160_v14 = vpop.f32.mrf.mxu1 }
 0x59f   :  { %v1185_v16 = vrot.slane %v1140_v12, 2  ;;  %v1186_v18 = vrot.slane %v1160_v14, 2 }
 0x5a1   :  { %v1189_v20 = vadd.f32 %v1185_v16, %v2463_v53  ;;  %v1190_v23 = vadd.f32 %v1186_v18, %v2462_v50 }
 0x5a3   :  { %v1302_v25 = vmul.f32 -1.442695, %v1189_v20  ;;  %v1303_v26 = vmul.f32 -1.442695, %v1190_v23 }
 0x5a5   :  { %1388 = vpow2.f32 %v1302_v25  ;;  %v1180_v5 = vpop.f32.mrf.mxu2 }
 0x5a6   :  { %1390 = vpow2.f32 %v1303_v26  ;;  %v1229_v32 = vadd.f32 %v2360_v57, %v1180_v5 }
 0x5a8   :  { %v1231_v46 = vrot.slane %v1229_v32, 2 }
 0x5ab   :  { %v1389_v31 = vpop.eup %1388 }
 0x5ac   :  { %v1391_v37 = vpop.eup %1390  ;;  %v1197_v40 = vadd.f32 1.0, %v1389_v31 }
 0x5ad   :  { %v1198_v54 = vadd.f32 1.0, %v1391_v37 }
 0x5ae   :  { %1392 = vrcp.f32 %v1197_v40  ;;  %v1210_v53 = vand.u32 2147483648, %v1197_v40  ;;  %v1208_v50 = vand.u32 2147483647, %v1197_v40  ;;  %vm1204_vm10 = vweird.f32 %v1197_v40 }
 0x5af   :  { %1394 = vrcp.f32 %v1198_v54  ;;  %v1225_v29 = vand.u32 2147483648, %v1198_v54  ;;  %vm1219_vm14 = vweird.f32 %v1198_v54  ;;  %v1223_v8 = vand.u32 2147483647, %v1198_v54 }
 0x5b0   :  { %v1211_v42 = vor.u32 1.1754944e-38, %v1210_v53  ;;  %vm1209_vm12 = vcmp.eq.f32.partialorder %v1208_v50, 8.507059e+37 }
 0x5b1   :  { %v1226_v57 = vor.u32 1.1754944e-38, %v1225_v29  ;;  %vm1224_vm0 = vcmp.eq.f32.partialorder %v1223_v8, 8.507059e+37 }
 0x5b4   :  { %v1393_v39 = vpop.eup %1392 }
 0x5b5   :  { %v1395_v3 = vpop.eup %1394  ;;  %v1200_v2 = vmul.f32 %v1393_v39, %v1197_v40  ;;  %vm1205_vm9 = vweird.f32 %v1393_v39 }
 0x5b6   :  { %v1215_v4 = vmul.f32 %v1395_v3, %v1198_v54  ;;  %vm1206_vm11 = vmor %vm1204_vm10, %vm1205_vm9  ;;  %vm1220_vm13 = vweird.f32 %v1395_v3 }
 0x5b7   :  { %v1201_v6 = vsub.f32 1.0, %v1200_v2  ;;  %vm1221_vm15 = vmor %vm1219_vm14, %vm1220_vm13 }
 0x5b8   :  { %v1216_v63 = vsub.f32 1.0, %v1215_v4 }
 0x5b9   :  { %v1202_v27 = vmul.f32 %v1393_v39, %v1201_v6 }
 0x5ba   :  { %v1217_v35 = vmul.f32 %v1395_v3, %v1216_v63 }
 0x5bb   :  { %v1203_v38 = vadd.f32 %v1393_v39, %v1202_v27 }
 0x5bc   :  { %v1218_v60 = vadd.f32 %v1395_v3, %v1217_v35 }
 0x5bd   :  { %v1207_v62 = vsel %vm1206_vm11, %v1393_v39, %v1203_v38 }
 0x5be   :  { %v1212_v59 = vsel %vm1209_vm12, %v1211_v42, %v1207_v62  ;;  %v1222_v17 = vsel %vm1221_vm15, %v1395_v3, %v1218_v60 }
 0x5bf   :  { %v1233_v7 = vmul.f32 %v1231_v46, %v1212_v59  ;;  %v1227_v34 = vsel %vm1224_vm0, %v1226_v57, %v1222_v17 }
 0x5c0   :  { %v1236_v21 = vsub.f32 1.0, %v1227_v34  ;;  %v1240_v45 = vmul.f32 %v1238_v36, %v1227_v34 }
 0x5c1   :  { %v1234_v33 = vadd.f32 %v1233_v7, %v2330_v55 }
 0x5c3   :  { %1396 = vtanh.f32 %v1234_v33 }
 0x5c9   :  { %v1397_v44 = vpop.eup %1396 }
 0x5ca   :  { %v1237_v24 = vmul.f32 %v1397_v44, %v1236_v21 }
 0x5cc   :  { %v1241_v55 = vadd.f32 %v1240_v45, %v1237_v24 }
 0x5ce   :  { %1243 = vst [vmem:[#allocation11 + $0x8] sm:$0xc0] %v1241_v55 }
 0x5cf   :  { %1244 = vst [vmem:[#allocation12 - $0x6] sm:$0xc0] %v1241_v55  ;;  %1257 = dma.vmem_to_hbm [thread:$0]  %s1250_s14, 256, %s1252_s17, [#allocation4], %s1633_s27, %s1633_s27, %s1634_s28  }
 0x5d0   :  { %1268 = dma.vmem_to_hbm [thread:$0]  %s1264_s1, 32, %s1266_s21, [#allocation13]  }
 0x5d1   :  { %1621 = dma.done.wait [#allocation4], 256  }
 0x5d2   :  { %1622 = vsyncadd [#allocation4], 4294967040 }
 0x5d3   :  { %1623 = dma.done.wait [#allocation13], 32  }
 0x5d4   :  { %1624 = vsyncadd [#allocation13], 4294967264 }
 0x5d5   :  { %1277 = vsyncpa [#allocation3], 1 }
 0x5d6   :  { %1278 = vsyncpa [#allocation6], 1 }
 0x5d7   :  { %1279 = vsyncpa [#allocation9], 1 }
 0x5d8   :  { %1280 = vsyncpa [#allocation4], 1 }
 0x5d9   :  { %1281 = vsyncpa [#allocation13], 1 }

</bundles_post_ra>
